<compile_context>
chip_gen: v7x
topology: tpu7x:2x2x1
jax: 0.10.0
libtpu: 0.0.40
codegen_flags: <defaults>
</compile_context>

<pallas_src>
import functools

import jax
import jax.numpy as jnp
from jax.experimental import pallas as pl
from jax.experimental.pallas import tpu as pltpu


# ----------------------------------------------------------------------------
# Helpers
# ----------------------------------------------------------------------------
def _round_up(v, m):
    return ((v + m - 1) // m) * m


def _padded_cols(n):
    """Output-channel padding: no pad below 128, else round up to 128."""
    return n if n < 128 else _round_up(n, 128)


def _pick_tk(k, tk_max=512):
    """K tile: split only when K is a 128-multiple larger than tk_max."""
    if k % 128 == 0 and k > tk_max:
        for t in (512, 256, 128):
            if k % t == 0:
                return t
    return k


def _pick_tn(np_):
    if np_ < 128:
        return np_
    return 256 if np_ % 256 == 0 else 128


# ----------------------------------------------------------------------------
# Pallas kernel: tiled  Y = act(X @ W + b)   (bf16 MXU, f32 accumulator)
# ----------------------------------------------------------------------------
def _matmul_bias_act_kernel(x_ref, w_ref, b_ref, o_ref, acc_ref, *, activation):
    @pl.when(pl.program_id(2) == 0)
    def _init():
        acc_ref[...] = jnp.zeros_like(acc_ref)

    acc_ref[...] += jnp.dot(x_ref[...], w_ref[...],
                            preferred_element_type=jnp.float32)

    @pl.when(pl.program_id(2) == pl.num_programs(2) - 1)
    def _epilogue():
        acc = acc_ref[...] + b_ref[...]          # (1, tn) broadcasts over rows
        if activation == "relu":
            acc = jnp.maximum(acc, 0.0)
        elif activation == "tanh":
            acc = jnp.tanh(acc)
        o_ref[...] = acc.astype(o_ref.dtype)


def fused_matmul_bias_act(x, w, b, n_out, activation, out_dtype,
                          tm_max=256, tk_max=512):
    """x: (M, K) float, w: (K, Np) bf16 (Np pre-aligned), b: (1, Np) f32.

    Returns act(x @ w + b)[:, :n_out] in `out_dtype`.
    """
    m, k = x.shape
    kw_, np_ = w.shape
    assert k == kw_

    # Tile selection (static, per-layer shapes).
    m_base = _round_up(m, 8)
    tm = min(tm_max, m_base)
    mp = _round_up(m_base, tm)
    tn = _pick_tn(np_)
    tk = _pick_tk(k, tk_max)
    n_k = k // tk

    x = x.astype(jnp.bfloat16)
    if mp != m:
        x = jnp.pad(x, ((0, mp - m), (0, 0)))

    grid = (mp // tm, np_ // tn, n_k)
    flops = 2 * mp * np_ * k
    bytes_accessed = (mp * k * 2 + k * np_ * 2 + np_ * 4
                      + mp * np_ * jnp.dtype(out_dtype).itemsize)

    out = pl.pallas_call(
        functools.partial(_matmul_bias_act_kernel, activation=activation),
        out_shape=jax.ShapeDtypeStruct((mp, np_), out_dtype),
        grid_spec=pltpu.PrefetchScalarGridSpec(
            num_scalar_prefetch=0,
            grid=grid,
            in_specs=[
                pl.BlockSpec((tm, tk), lambda i, j, kk: (i, kk)),
                pl.BlockSpec((tk, tn), lambda i, j, kk: (kk, j)),
                pl.BlockSpec((1, tn), lambda i, j, kk: (0, j)),
            ],
            out_specs=pl.BlockSpec((tm, tn), lambda i, j, kk: (i, j)),
            scratch_shapes=[pltpu.VMEM((tm, tn), jnp.float32)],
        ),
        compiler_params=pltpu.CompilerParams(
            dimension_semantics=("parallel", "parallel", "arbitrary")),
        cost_estimate=pl.CostEstimate(
            flops=flops,
            transcendentals=mp * np_ if activation == "tanh" else 0,
            bytes_accessed=bytes_accessed),
    )(x, w, b)

    if mp != m or np_ != n_out:
        out = out[:m, :n_out]
    return out


# ----------------------------------------------------------------------------
# Glue: im2col, conv wrapper, pixel shuffle, spectral norm
# ----------------------------------------------------------------------------
def _im2col(x_nhwc, kh, kw, stride, pad):
    n, h, w, c = x_nhwc.shape
    xp = jnp.pad(x_nhwc, ((0, 0), (pad, pad), (pad, pad), (0, 0)))
    ho = (h + 2 * pad - kh) // stride + 1
    wo = (w + 2 * pad - kw) // stride + 1
    cols = []
    for dy in range(kh):
        for dx in range(kw):
            patch = xp[:, dy:dy + stride * ho:stride, dx:dx + stride * wo:stride, :]
            cols.append(patch)
    patches = jnp.concatenate(cols, axis=-1)       # (N, Ho, Wo, kh*kw*C)
    return patches.reshape(n * ho * wo, kh * kw * c), ho, wo


def conv2d_fused(x_nhwc, w_mat, b_row, ksize, stride, pad, c_out,
                 activation, out_dtype):
    n, h, w, c = x_nhwc.shape
    if ksize == 1 and stride == 1 and pad == 0:
        cols, ho, wo = x_nhwc.reshape(n * h * w, c), h, w
    else:
        cols, ho, wo = _im2col(x_nhwc, ksize, ksize, stride, pad)
    out = fused_matmul_bias_act(cols, w_mat, b_row, c_out, activation, out_dtype)
    return out.reshape(n, ho, wo, c_out)


def _pixel_shuffle_perm(c_out, r):
    """Column permutation folding the pixel-shuffle channel reorder into W.

    New channel q = ry*r*C + rx*C + c maps to PyTorch channel c*r*r + ry*r + rx.
    """
    c = c_out // (r * r)
    perm = [ci * r * r + ry * r + rx
            for ry in range(r) for rx in range(r) for ci in range(c)]
    return jnp.array(perm, dtype=jnp.int32)


def pixel_shuffle_chlast(x_nhwc, r):
    """Pixel shuffle for conv outputs whose channels are already (ry, rx, C)
    ordered (permutation folded into the weights).  Equivalent to PyTorch
    PixelShuffle on the original channel order; the lane (C) axis is untouched."""
    n, h, w, rrc = x_nhwc.shape
    c = rrc // (r * r)
    x = x_nhwc.reshape(n, h, w, r, r, c)
    x = jnp.transpose(x, (0, 1, 3, 2, 4, 5))       # (N, H, ry, W, rx, C)
    return x.reshape(n, h * r, w * r, c)


def _l2norm(v, eps=1e-12):
    return v / (jnp.linalg.norm(v) + eps)


def spectral_normalize(w_oihw, u, n_power_iterations=1):
    """SpectralNorm wrapper semantics: w / sigma, sigma from power iteration."""
    c_out = w_oihw.shape[0]
    w_mat = w_oihw.reshape(c_out, -1)
    v = None
    for _ in range(n_power_iterations):
        v = _l2norm(w_mat.T @ u)
        u = _l2norm(w_mat @ v)
    sigma = u @ (w_mat @ v)
    return w_oihw / sigma


# ----------------------------------------------------------------------------
# Generator
# ----------------------------------------------------------------------------
class Generator:
    @staticmethod
    def _layer_cfg(nf):
        # (cin, cout, kernel, stride, pad, activation, pixel_shuffle_after)
        return [
            (2,       nf,          4, 2, 1, "relu", False),
            (nf,      2 * nf,      4, 2, 1, "relu", False),
            (2 * nf,  4 * nf,      4, 2, 1, "relu", False),
            (4 * nf,  8 * nf,      4, 2, 1, "relu", False),
            (8 * nf,  16 * nf,     3, 1, 1, "relu", False),
            (16 * nf, 8 * nf,      3, 1, 1, "relu", False),
            (8 * nf,  4 * 4 * nf,  1, 1, 0, "relu", True),
            (4 * nf,  4 * 2 * nf,  1, 1, 0, "relu", True),
            (2 * nf,  4 * nf,      1, 1, 0, "relu", True),
            (nf,      4 * 1,       1, 1, 0, "tanh", True),
        ]

    def __init__(self, nf, key):
        self.nf = nf
        self.cfg = self._layer_cfg(nf)
        self.weights = []
        for i, (cin, cout, k, s, p, act, fold) in enumerate(self.cfg):
            kw_, kb_, ku_ = jax.random.split(jax.random.fold_in(key, i), 3)
            w = jax.random.normal(kw_, (cout, cin, k, k), jnp.float32) * 0.05
            b = jax.random.normal(kb_, (cout,), jnp.float32) * 0.01
            u = jax.random.normal(ku_, (cout,), jnp.float32)  # spectral-norm u

            # Spectral norm with a fixed u gives identical results every call
            # (PyTorch only updates u in training mode), so hoist it to init.
            w_bar = spectral_normalize(w, u)
            # OIHW -> (kh, kw, cin, cout) -> (K, cout): matches im2col ordering.
            w_mat = jnp.transpose(w_bar, (2, 3, 1, 0)).reshape(k * k * cin, cout)
            if fold:  # fold pixel-shuffle channel permutation into the weights
                perm = _pixel_shuffle_perm(cout, 2)
                w_mat = w_mat[:, perm]
                b = b[perm]
            n_pad = _padded_cols(cout)
            if n_pad != cout:
                w_mat = jnp.pad(w_mat, ((0, 0), (0, n_pad - cout)))
                b = jnp.pad(b, (0, n_pad - cout))
            self.weights.append(dict(
                w_mat=w_mat.astype(jnp.bfloat16),
                b=b.reshape(1, n_pad).astype(jnp.float32),
            ))
        self._fwd = jax.jit(self._forward)

    def _forward(self, weights, x_nchw, gantry_angle):
        n, _, h, w = x_nchw.shape
        g = gantry_angle.reshape(n, 1, 1, 1).astype(x_nchw.dtype)
        g_rep = jnp.broadcast_to(g, (n, 1, h, w))
        x = jnp.concatenate([x_nchw, g_rep], axis=1)   # (N, 2, H, W)
        x = jnp.transpose(x, (0, 2, 3, 1))             # NCHW -> NHWC

        n_layers = len(self.cfg)
        for idx, (cin, cout, k, s, p, act, fold) in enumerate(self.cfg):
            wd = weights[idx]
            out_dtype = jnp.float32 if idx == n_layers - 1 else jnp.bfloat16
            # relu/tanh are elementwise, so fusing them into the conv before
            # the pixel-shuffle permutation is exactly equivalent.
            x = conv2d_fused(x, wd["w_mat"], wd["b"], k, s, p, cout, act,
                             out_dtype)
            if fold:
                x = pixel_shuffle_chlast(x, 2)

        return jnp.transpose(x, (0, 3, 1, 2))          # NHWC -> NCHW

    def __call__(self, x_nchw, gantry_angle):
        return self._fwd(self.weights, x_nchw, gantry_angle)


# ----------------------------------------------------------------------------
if __name__ == "__main__":
    key = jax.random.PRNGKey(0)
    kx, kg, kp = jax.random.split(key, 3)

    N, H, W = 2, 16, 16
    nf = 4
    x = jax.random.normal(kx, (N, 1, H, W), jnp.float32)     # single-channel image
    gantry_angle = jax.random.uniform(kg, (N,), jnp.float32) * 3.0

    gen = Generator(nf=nf, key=kp)
    out = gen(x, gantry_angle)
    out = jax.block_until_ready(out)

    assert out.shape == (N, 1, H, W), out.shape
    assert bool(jnp.all(jnp.isfinite(out)))
    print("KERNEL_OK")
</pallas_src>

<mosaic_0001>
module attributes {stable_mosaic.version = 11 : i64} {
  func.func @_matmul_bias_act_kernel(%arg0: i32, %arg1: i32, %arg2: i32, %arg3: memref<128x32xbf16, #tpu.memory_space<vmem>>, %arg4: memref<32x4xbf16, #tpu.memory_space<vmem>>, %arg5: memref<1x4xf32, #tpu.memory_space<vmem>>, %arg6: memref<128x4xbf16, #tpu.memory_space<vmem>>, %arg7: memref<128x4xf32, #tpu.memory_space<vmem>>) attributes {dimension_semantics = [#tpu.dimension_semantics<parallel>, #tpu.dimension_semantics<parallel>, #tpu.dimension_semantics<arbitrary>], iteration_bounds = array<i64: 1, 1, 1>, scalar_prefetch = 0 : i64, scratch_operands = 1 : i64, tpu.core_type = #tpu.core_type<tc>, window_params = [{transform_indices = @transform_0, window_bounds = array<i64: 128, 32>}, {transform_indices = @transform_1, window_bounds = array<i64: 32, 4>}, {transform_indices = @transform_2, window_bounds = array<i64: 1, 4>}, {transform_indices = @transform_3, window_bounds = array<i64: 128, 4>}]} {
    %c0_i32 = arith.constant 0 : i32
    %0 = arith.cmpi eq, %arg2, %c0_i32 : i32
    %1 = arith.extui %0 : i1 to i32
    %c0_i32_0 = arith.constant 0 : i32
    %2 = arith.cmpi ne, %1, %c0_i32_0 : i32
    scf.if %2 {
      %cst_10 = arith.constant 0.000000e+00 : f32
      %12 = vector.broadcast %cst_10 : f32 to vector<128x4xf32>
      %c0_11 = arith.constant 0 : index
      %c0_12 = arith.constant 0 : index
      %13 = vector.load %arg7[%c0_11, %c0_12] : memref<128x4xf32, #tpu.memory_space<vmem>>, vector<128x4xf32>
      tpu.vector_store %arg7[%c0_11, %c0_12], %12 {strides = array<i32>} : memref<128x4xf32, #tpu.memory_space<vmem>>, vector<128x4xf32>,
    } else {
    }
    %c0 = arith.constant 0 : index
    %c0_1 = arith.constant 0 : index
    %3 = vector.load %arg7[%c0, %c0_1] : memref<128x4xf32, #tpu.memory_space<vmem>>, vector<128x4xf32>
    %c0_2 = arith.constant 0 : index
    %c0_3 = arith.constant 0 : index
    %4 = vector.load %arg3[%c0_2, %c0_3] : memref<128x32xbf16, #tpu.memory_space<vmem>>, vector<128x32xbf16>
    %c0_4 = arith.constant 0 : index
    %c0_5 = arith.constant 0 : index
    %5 = vector.load %arg4[%c0_4, %c0_5] : memref<32x4xbf16, #tpu.memory_space<vmem>>, vector<32x4xbf16>
    %cst = arith.constant dense<0.000000e+00> : vector<128x4xf32>
    %6 = tpu.matmul %4, %5, %cst {dimension_numbers = #tpu.dot_dimension_numbers<[1], [0], [0], [1], [0, 0, 1, 1], [], []>} : vector<128x32xbf16>, vector<32x4xbf16>, vector<128x4xf32> -> vector<128x4xf32>
    %7 = arith.addf %3, %6 : vector<128x4xf32>
    %c0_6 = arith.constant 0 : index
    %c0_7 = arith.constant 0 : index
    %8 = vector.load %arg7[%c0_6, %c0_7] : memref<128x4xf32, #tpu.memory_space<vmem>>, vector<128x4xf32>
    tpu.vector_store %arg7[%c0_6, %c0_7], %7 {strides = array<i32>} : memref<128x4xf32, #tpu.memory_space<vmem>>, vector<128x4xf32>,
    %c0_i32_8 = arith.constant 0 : i32
    %9 = arith.cmpi eq, %arg2, %c0_i32_8 : i32
    %10 = arith.extui %9 : i1 to i32
    %c0_i32_9 = arith.constant 0 : i32
    %11 = arith.cmpi ne, %10, %c0_i32_9 : i32
    scf.if %11 {
      %c0_10 = arith.constant 0 : index
      %c0_11 = arith.constant 0 : index
      %12 = vector.load %arg7[%c0_10, %c0_11] : memref<128x4xf32, #tpu.memory_space<vmem>>, vector<128x4xf32>
      %c0_12 = arith.constant 0 : index
      %c0_13 = arith.constant 0 : index
      %13 = vector.load %arg5[%c0_12, %c0_13] : memref<1x4xf32, #tpu.memory_space<vmem>>, vector<1x4xf32>
      %14 = vector.broadcast %13 : vector<1x4xf32> to vector<128x4xf32>
      %15 = arith.addf %12, %14 : vector<128x4xf32>
      %cst_14 = arith.constant 0.000000e+00 : f32
      %16 = vector.broadcast %cst_14 : f32 to vector<128x4xf32>
      %17 = arith.maximumf %15, %16 : vector<128x4xf32>
      %18 = arith.truncf %17 : vector<128x4xf32> to vector<128x4xbf16>
      %c0_15 = arith.constant 0 : index
      %c0_16 = arith.constant 0 : index
      %19 = vector.load %arg6[%c0_15, %c0_16] : memref<128x4xbf16, #tpu.memory_space<vmem>>, vector<128x4xbf16>
      tpu.vector_store %arg6[%c0_15, %c0_16], %18 {strides = array<i32>} : memref<128x4xbf16, #tpu.memory_space<vmem>>, vector<128x4xbf16>,
    } else {
    }
    return
  }
  func.func @transform_0(%arg0: i32, %arg1: i32, %arg2: i32) -> (i32, i32) {
    %c0_i32 = arith.constant 0 : i32
    return %arg0, %arg2 : i32, i32
  }
  func.func @transform_1(%arg0: i32, %arg1: i32, %arg2: i32) -> (i32, i32) {
    %c0_i32 = arith.constant 0 : i32
    return %arg2, %arg1 : i32, i32
  }
  func.func @transform_2(%arg0: i32, %arg1: i32, %arg2: i32) -> (i32, i32) {
    %c0_i32 = arith.constant 0 : i32
    %c0_i32_0 = arith.constant 0 : i32
    return %c0_i32, %arg1 : i32, i32
  }
  func.func @transform_3(%arg0: i32, %arg1: i32, %arg2: i32) -> (i32, i32) {
    %c0_i32 = arith.constant 0 : i32
    return %arg0, %arg1 : i32, i32
  }
}

module attributes {stable_mosaic.version = 11 : i64} {
  func.func @_matmul_bias_act_kernel(%arg0: i32, %arg1: i32, %arg2: i32, %arg3: memref<32x64xbf16, #tpu.memory_space<vmem>>, %arg4: memref<64x8xbf16, #tpu.memory_space<vmem>>, %arg5: memref<1x8xf32, #tpu.memory_space<vmem>>, %arg6: memref<32x8xbf16, #tpu.memory_space<vmem>>, %arg7: memref<32x8xf32, #tpu.memory_space<vmem>>) attributes {dimension_semantics = [#tpu.dimension_semantics<parallel>, #tpu.dimension_semantics<parallel>, #tpu.dimension_semantics<arbitrary>], iteration_bounds = array<i64: 1, 1, 1>, scalar_prefetch = 0 : i64, scratch_operands = 1 : i64, tpu.core_type = #tpu.core_type<tc>, window_params = [{transform_indices = @transform_0, window_bounds = array<i64: 32, 64>}, {transform_indices = @transform_1, window_bounds = array<i64: 64, 8>}, {transform_indices = @transform_2, window_bounds = array<i64: 1, 8>}, {transform_indices = @transform_3, window_bounds = array<i64: 32, 8>}]} {
    %c0_i32 = arith.constant 0 : i32
    %0 = arith.cmpi eq, %arg2, %c0_i32 : i32
    %1 = arith.extui %0 : i1 to i32
    %c0_i32_0 = arith.constant 0 : i32
    %2 = arith.cmpi ne, %1, %c0_i32_0 : i32
    scf.if %2 {
      %cst_10 = arith.constant 0.000000e+00 : f32
      %12 = vector.broadcast %cst_10 : f32 to vector<32x8xf32>
      %c0_11 = arith.constant 0 : index
      %c0_12 = arith.constant 0 : index
      %13 = vector.load %arg7[%c0_11, %c0_12] : memref<32x8xf32, #tpu.memory_space<vmem>>, vector<32x8xf32>
      tpu.vector_store %arg7[%c0_11, %c0_12], %12 {strides = array<i32>} : memref<32x8xf32, #tpu.memory_space<vmem>>, vector<32x8xf32>,
    } else {
    }
    %c0 = arith.constant 0 : index
    %c0_1 = arith.constant 0 : index
    %3 = vector.load %arg7[%c0, %c0_1] : memref<32x8xf32, #tpu.memory_space<vmem>>, vector<32x8xf32>
    %c0_2 = arith.constant 0 : index
    %c0_3 = arith.constant 0 : index
    %4 = vector.load %arg3[%c0_2, %c0_3] : memref<32x64xbf16, #tpu.memory_space<vmem>>, vector<32x64xbf16>
    %c0_4 = arith.constant 0 : index
    %c0_5 = arith.constant 0 : index
    %5 = vector.load %arg4[%c0_4, %c0_5] : memref<64x8xbf16, #tpu.memory_space<vmem>>, vector<64x8xbf16>
    %cst = arith.constant dense<0.000000e+00> : vector<32x8xf32>
    %6 = tpu.matmul %4, %5, %cst {dimension_numbers = #tpu.dot_dimension_numbers<[1], [0], [0], [1], [0, 0, 1, 1], [], []>} : vector<32x64xbf16>, vector<64x8xbf16>, vector<32x8xf32> -> vector<32x8xf32>
    %7 = arith.addf %3, %6 : vector<32x8xf32>
    %c0_6 = arith.constant 0 : index
    %c0_7 = arith.constant 0 : index
    %8 = vector.load %arg7[%c0_6, %c0_7] : memref<32x8xf32, #tpu.memory_space<vmem>>, vector<32x8xf32>
    tpu.vector_store %arg7[%c0_6, %c0_7], %7 {strides = array<i32>} : memref<32x8xf32, #tpu.memory_space<vmem>>, vector<32x8xf32>,
    %c0_i32_8 = arith.constant 0 : i32
    %9 = arith.cmpi eq, %arg2, %c0_i32_8 : i32
    %10 = arith.extui %9 : i1 to i32
    %c0_i32_9 = arith.constant 0 : i32
    %11 = arith.cmpi ne, %10, %c0_i32_9 : i32
    scf.if %11 {
      %c0_10 = arith.constant 0 : index
      %c0_11 = arith.constant 0 : index
      %12 = vector.load %arg7[%c0_10, %c0_11] : memref<32x8xf32, #tpu.memory_space<vmem>>, vector<32x8xf32>
      %c0_12 = arith.constant 0 : index
      %c0_13 = arith.constant 0 : index
      %13 = vector.load %arg5[%c0_12, %c0_13] : memref<1x8xf32, #tpu.memory_space<vmem>>, vector<1x8xf32>
      %14 = vector.broadcast %13 : vector<1x8xf32> to vector<32x8xf32>
      %15 = arith.addf %12, %14 : vector<32x8xf32>
      %cst_14 = arith.constant 0.000000e+00 : f32
      %16 = vector.broadcast %cst_14 : f32 to vector<32x8xf32>
      %17 = arith.maximumf %15, %16 : vector<32x8xf32>
      %18 = arith.truncf %17 : vector<32x8xf32> to vector<32x8xbf16>
      %c0_15 = arith.constant 0 : index
      %c0_16 = arith.constant 0 : index
      %19 = vector.load %arg6[%c0_15, %c0_16] : memref<32x8xbf16, #tpu.memory_space<vmem>>, vector<32x8xbf16>
      tpu.vector_store %arg6[%c0_15, %c0_16], %18 {strides = array<i32>} : memref<32x8xbf16, #tpu.memory_space<vmem>>, vector<32x8xbf16>,
    } else {
    }
    return
  }
  func.func @transform_0(%arg0: i32, %arg1: i32, %arg2: i32) -> (i32, i32) {
    %c0_i32 = arith.constant 0 : i32
    return %arg0, %arg2 : i32, i32
  }
  func.func @transform_1(%arg0: i32, %arg1: i32, %arg2: i32) -> (i32, i32) {
    %c0_i32 = arith.constant 0 : i32
    return %arg2, %arg1 : i32, i32
  }
  func.func @transform_2(%arg0: i32, %arg1: i32, %arg2: i32) -> (i32, i32) {
    %c0_i32 = arith.constant 0 : i32
    %c0_i32_0 = arith.constant 0 : i32
    return %c0_i32, %arg1 : i32, i32
  }
  func.func @transform_3(%arg0: i32, %arg1: i32, %arg2: i32) -> (i32, i32) {
    %c0_i32 = arith.constant 0 : i32
    return %arg0, %arg1 : i32, i32
  }
}

module attributes {stable_mosaic.version = 11 : i64} {
  func.func @_matmul_bias_act_kernel(%arg0: i32, %arg1: i32, %arg2: i32, %arg3: memref<8x128xbf16, #tpu.memory_space<vmem>>, %arg4: memref<128x16xbf16, #tpu.memory_space<vmem>>, %arg5: memref<1x16xf32, #tpu.memory_space<vmem>>, %arg6: memref<8x16xbf16, #tpu.memory_space<vmem>>, %arg7: memref<8x16xf32, #tpu.memory_space<vmem>>) attributes {dimension_semantics = [#tpu.dimension_semantics<parallel>, #tpu.dimension_semantics<parallel>, #tpu.dimension_semantics<arbitrary>], iteration_bounds = array<i64: 1, 1, 1>, scalar_prefetch = 0 : i64, scratch_operands = 1 : i64, tpu.core_type = #tpu.core_type<tc>, window_params = [{transform_indices = @transform_0, window_bounds = array<i64: 8, 128>}, {transform_indices = @transform_1, window_bounds = array<i64: 128, 16>}, {transform_indices = @transform_2, window_bounds = array<i64: 1, 16>}, {transform_indices = @transform_3, window_bounds = array<i64: 8, 16>}]} {
    %c0_i32 = arith.constant 0 : i32
    %0 = arith.cmpi eq, %arg2, %c0_i32 : i32
    %1 = arith.extui %0 : i1 to i32
    %c0_i32_0 = arith.constant 0 : i32
    %2 = arith.cmpi ne, %1, %c0_i32_0 : i32
    scf.if %2 {
      %cst_10 = arith.constant 0.000000e+00 : f32
      %12 = vector.broadcast %cst_10 : f32 to vector<8x16xf32>
      %c0_11 = arith.constant 0 : index
      %c0_12 = arith.constant 0 : index
      %13 = vector.load %arg7[%c0_11, %c0_12] : memref<8x16xf32, #tpu.memory_space<vmem>>, vector<8x16xf32>
      tpu.vector_store %arg7[%c0_11, %c0_12], %12 {strides = array<i32>} : memref<8x16xf32, #tpu.memory_space<vmem>>, vector<8x16xf32>,
    } else {
    }
    %c0 = arith.constant 0 : index
    %c0_1 = arith.constant 0 : index
    %3 = vector.load %arg7[%c0, %c0_1] : memref<8x16xf32, #tpu.memory_space<vmem>>, vector<8x16xf32>
    %c0_2 = arith.constant 0 : index
    %c0_3 = arith.constant 0 : index
    %4 = vector.load %arg3[%c0_2, %c0_3] : memref<8x128xbf16, #tpu.memory_space<vmem>>, vector<8x128xbf16>
    %c0_4 = arith.constant 0 : index
    %c0_5 = arith.constant 0 : index
    %5 = vector.load %arg4[%c0_4, %c0_5] : memref<128x16xbf16, #tpu.memory_space<vmem>>, vector<128x16xbf16>
    %cst = arith.constant dense<0.000000e+00> : vector<8x16xf32>
    %6 = tpu.matmul %4, %5, %cst {dimension_numbers = #tpu.dot_dimension_numbers<[1], [0], [0], [1], [0, 0, 1, 1], [], []>} : vector<8x128xbf16>, vector<128x16xbf16>, vector<8x16xf32> -> vector<8x16xf32>
    %7 = arith.addf %3, %6 : vector<8x16xf32>
    %c0_6 = arith.constant 0 : index
    %c0_7 = arith.constant 0 : index
    %8 = vector.load %arg7[%c0_6, %c0_7] : memref<8x16xf32, #tpu.memory_space<vmem>>, vector<8x16xf32>
    tpu.vector_store %arg7[%c0_6, %c0_7], %7 {strides = array<i32>} : memref<8x16xf32, #tpu.memory_space<vmem>>, vector<8x16xf32>,
    %c0_i32_8 = arith.constant 0 : i32
    %9 = arith.cmpi eq, %arg2, %c0_i32_8 : i32
    %10 = arith.extui %9 : i1 to i32
    %c0_i32_9 = arith.constant 0 : i32
    %11 = arith.cmpi ne, %10, %c0_i32_9 : i32
    scf.if %11 {
      %c0_10 = arith.constant 0 : index
      %c0_11 = arith.constant 0 : index
      %12 = vector.load %arg7[%c0_10, %c0_11] : memref<8x16xf32, #tpu.memory_space<vmem>>, vector<8x16xf32>
      %c0_12 = arith.constant 0 : index
      %c0_13 = arith.constant 0 : index
      %13 = vector.load %arg5[%c0_12, %c0_13] : memref<1x16xf32, #tpu.memory_space<vmem>>, vector<1x16xf32>
      %14 = vector.broadcast %13 : vector<1x16xf32> to vector<8x16xf32>
      %15 = arith.addf %12, %14 : vector<8x16xf32>
      %cst_14 = arith.constant 0.000000e+00 : f32
      %16 = vector.broadcast %cst_14 : f32 to vector<8x16xf32>
      %17 = arith.maximumf %15, %16 : vector<8x16xf32>
      %18 = arith.truncf %17 : vector<8x16xf32> to vector<8x16xbf16>
      %c0_15 = arith.constant 0 : index
      %c0_16 = arith.constant 0 : index
      %19 = vector.load %arg6[%c0_15, %c0_16] : memref<8x16xbf16, #tpu.memory_space<vmem>>, vector<8x16xbf16>
      tpu.vector_store %arg6[%c0_15, %c0_16], %18 {strides = array<i32>} : memref<8x16xbf16, #tpu.memory_space<vmem>>, vector<8x16xbf16>,
    } else {
    }
    return
  }
  func.func @transform_0(%arg0: i32, %arg1: i32, %arg2: i32) -> (i32, i32) {
    %c0_i32 = arith.constant 0 : i32
    return %arg0, %arg2 : i32, i32
  }
  func.func @transform_1(%arg0: i32, %arg1: i32, %arg2: i32) -> (i32, i32) {
    %c0_i32 = arith.constant 0 : i32
    return %arg2, %arg1 : i32, i32
  }
  func.func @transform_2(%arg0: i32, %arg1: i32, %arg2: i32) -> (i32, i32) {
    %c0_i32 = arith.constant 0 : i32
    %c0_i32_0 = arith.constant 0 : i32
    return %c0_i32, %arg1 : i32, i32
  }
  func.func @transform_3(%arg0: i32, %arg1: i32, %arg2: i32) -> (i32, i32) {
    %c0_i32 = arith.constant 0 : i32
    return %arg0, %arg1 : i32, i32
  }
}

module attributes {stable_mosaic.version = 11 : i64} {
  func.func @_matmul_bias_act_kernel(%arg0: i32, %arg1: i32, %arg2: i32, %arg3: memref<8x256xbf16, #tpu.memory_space<vmem>>, %arg4: memref<256x32xbf16, #tpu.memory_space<vmem>>, %arg5: memref<1x32xf32, #tpu.memory_space<vmem>>, %arg6: memref<8x32xbf16, #tpu.memory_space<vmem>>, %arg7: memref<8x32xf32, #tpu.memory_space<vmem>>) attributes {dimension_semantics = [#tpu.dimension_semantics<parallel>, #tpu.dimension_semantics<parallel>, #tpu.dimension_semantics<arbitrary>], iteration_bounds = array<i64: 1, 1, 1>, scalar_prefetch = 0 : i64, scratch_operands = 1 : i64, tpu.core_type = #tpu.core_type<tc>, window_params = [{transform_indices = @transform_0, window_bounds = array<i64: 8, 256>}, {transform_indices = @transform_1, window_bounds = array<i64: 256, 32>}, {transform_indices = @transform_2, window_bounds = array<i64: 1, 32>}, {transform_indices = @transform_3, window_bounds = array<i64: 8, 32>}]} {
    %c0_i32 = arith.constant 0 : i32
    %0 = arith.cmpi eq, %arg2, %c0_i32 : i32
    %1 = arith.extui %0 : i1 to i32
    %c0_i32_0 = arith.constant 0 : i32
    %2 = arith.cmpi ne, %1, %c0_i32_0 : i32
    scf.if %2 {
      %cst_10 = arith.constant 0.000000e+00 : f32
      %12 = vector.broadcast %cst_10 : f32 to vector<8x32xf32>
      %c0_11 = arith.constant 0 : index
      %c0_12 = arith.constant 0 : index
      %13 = vector.load %arg7[%c0_11, %c0_12] : memref<8x32xf32, #tpu.memory_space<vmem>>, vector<8x32xf32>
      tpu.vector_store %arg7[%c0_11, %c0_12], %12 {strides = array<i32>} : memref<8x32xf32, #tpu.memory_space<vmem>>, vector<8x32xf32>,
    } else {
    }
    %c0 = arith.constant 0 : index
    %c0_1 = arith.constant 0 : index
    %3 = vector.load %arg7[%c0, %c0_1] : memref<8x32xf32, #tpu.memory_space<vmem>>, vector<8x32xf32>
    %c0_2 = arith.constant 0 : index
    %c0_3 = arith.constant 0 : index
    %4 = vector.load %arg3[%c0_2, %c0_3] : memref<8x256xbf16, #tpu.memory_space<vmem>>, vector<8x256xbf16>
    %c0_4 = arith.constant 0 : index
    %c0_5 = arith.constant 0 : index
    %5 = vector.load %arg4[%c0_4, %c0_5] : memref<256x32xbf16, #tpu.memory_space<vmem>>, vector<256x32xbf16>
    %cst = arith.constant dense<0.000000e+00> : vector<8x32xf32>
    %6 = tpu.matmul %4, %5, %cst {dimension_numbers = #tpu.dot_dimension_numbers<[1], [0], [0], [1], [0, 0, 1, 1], [], []>} : vector<8x256xbf16>, vector<256x32xbf16>, vector<8x32xf32> -> vector<8x32xf32>
    %7 = arith.addf %3, %6 : vector<8x32xf32>
    %c0_6 = arith.constant 0 : index
    %c0_7 = arith.constant 0 : index
    %8 = vector.load %arg7[%c0_6, %c0_7] : memref<8x32xf32, #tpu.memory_space<vmem>>, vector<8x32xf32>
    tpu.vector_store %arg7[%c0_6, %c0_7], %7 {strides = array<i32>} : memref<8x32xf32, #tpu.memory_space<vmem>>, vector<8x32xf32>,
    %c0_i32_8 = arith.constant 0 : i32
    %9 = arith.cmpi eq, %arg2, %c0_i32_8 : i32
    %10 = arith.extui %9 : i1 to i32
    %c0_i32_9 = arith.constant 0 : i32
    %11 = arith.cmpi ne, %10, %c0_i32_9 : i32
    scf.if %11 {
      %c0_10 = arith.constant 0 : index
      %c0_11 = arith.constant 0 : index
      %12 = vector.load %arg7[%c0_10, %c0_11] : memref<8x32xf32, #tpu.memory_space<vmem>>, vector<8x32xf32>
      %c0_12 = arith.constant 0 : index
      %c0_13 = arith.constant 0 : index
      %13 = vector.load %arg5[%c0_12, %c0_13] : memref<1x32xf32, #tpu.memory_space<vmem>>, vector<1x32xf32>
      %14 = vector.broadcast %13 : vector<1x32xf32> to vector<8x32xf32>
      %15 = arith.addf %12, %14 : vector<8x32xf32>
      %cst_14 = arith.constant 0.000000e+00 : f32
      %16 = vector.broadcast %cst_14 : f32 to vector<8x32xf32>
      %17 = arith.maximumf %15, %16 : vector<8x32xf32>
      %18 = arith.truncf %17 : vector<8x32xf32> to vector<8x32xbf16>
      %c0_15 = arith.constant 0 : index
      %c0_16 = arith.constant 0 : index
      %19 = vector.load %arg6[%c0_15, %c0_16] : memref<8x32xbf16, #tpu.memory_space<vmem>>, vector<8x32xbf16>
      tpu.vector_store %arg6[%c0_15, %c0_16], %18 {strides = array<i32>} : memref<8x32xbf16, #tpu.memory_space<vmem>>, vector<8x32xbf16>,
    } else {
    }
    return
  }
  func.func @transform_0(%arg0: i32, %arg1: i32, %arg2: i32) -> (i32, i32) {
    %c0_i32 = arith.constant 0 : i32
    return %arg0, %arg2 : i32, i32
  }
  func.func @transform_1(%arg0: i32, %arg1: i32, %arg2: i32) -> (i32, i32) {
    %c0_i32 = arith.constant 0 : i32
    return %arg2, %arg1 : i32, i32
  }
  func.func @transform_2(%arg0: i32, %arg1: i32, %arg2: i32) -> (i32, i32) {
    %c0_i32 = arith.constant 0 : i32
    %c0_i32_0 = arith.constant 0 : i32
    return %c0_i32, %arg1 : i32, i32
  }
  func.func @transform_3(%arg0: i32, %arg1: i32, %arg2: i32) -> (i32, i32) {
    %c0_i32 = arith.constant 0 : i32
    return %arg0, %arg1 : i32, i32
  }
}

module attributes {stable_mosaic.version = 11 : i64} {
  func.func @_matmul_bias_act_kernel(%arg0: i32, %arg1: i32, %arg2: i32, %arg3: memref<8x288xbf16, #tpu.memory_space<vmem>>, %arg4: memref<288x64xbf16, #tpu.memory_space<vmem>>, %arg5: memref<1x64xf32, #tpu.memory_space<vmem>>, %arg6: memref<8x64xbf16, #tpu.memory_space<vmem>>, %arg7: memref<8x64xf32, #tpu.memory_space<vmem>>) attributes {dimension_semantics = [#tpu.dimension_semantics<parallel>, #tpu.dimension_semantics<parallel>, #tpu.dimension_semantics<arbitrary>], iteration_bounds = array<i64: 1, 1, 1>, scalar_prefetch = 0 : i64, scratch_operands = 1 : i64, tpu.core_type = #tpu.core_type<tc>, window_params = [{transform_indices = @transform_0, window_bounds = array<i64: 8, 288>}, {transform_indices = @transform_1, window_bounds = array<i64: 288, 64>}, {transform_indices = @transform_2, window_bounds = array<i64: 1, 64>}, {transform_indices = @transform_3, window_bounds = array<i64: 8, 64>}]} {
    %c0_i32 = arith.constant 0 : i32
    %0 = arith.cmpi eq, %arg2, %c0_i32 : i32
    %1 = arith.extui %0 : i1 to i32
    %c0_i32_0 = arith.constant 0 : i32
    %2 = arith.cmpi ne, %1, %c0_i32_0 : i32
    scf.if %2 {
      %cst_10 = arith.constant 0.000000e+00 : f32
      %12 = vector.broadcast %cst_10 : f32 to vector<8x64xf32>
      %c0_11 = arith.constant 0 : index
      %c0_12 = arith.constant 0 : index
      %13 = vector.load %arg7[%c0_11, %c0_12] : memref<8x64xf32, #tpu.memory_space<vmem>>, vector<8x64xf32>
      tpu.vector_store %arg7[%c0_11, %c0_12], %12 {strides = array<i32>} : memref<8x64xf32, #tpu.memory_space<vmem>>, vector<8x64xf32>,
    } else {
    }
    %c0 = arith.constant 0 : index
    %c0_1 = arith.constant 0 : index
    %3 = vector.load %arg7[%c0, %c0_1] : memref<8x64xf32, #tpu.memory_space<vmem>>, vector<8x64xf32>
    %c0_2 = arith.constant 0 : index
    %c0_3 = arith.constant 0 : index
    %4 = vector.load %arg3[%c0_2, %c0_3] : memref<8x288xbf16, #tpu.memory_space<vmem>>, vector<8x288xbf16>
    %c0_4 = arith.constant 0 : index
    %c0_5 = arith.constant 0 : index
    %5 = vector.load %arg4[%c0_4, %c0_5] : memref<288x64xbf16, #tpu.memory_space<vmem>>, vector<288x64xbf16>
    %cst = arith.constant dense<0.000000e+00> : vector<8x64xf32>
    %6 = tpu.matmul %4, %5, %cst {dimension_numbers = #tpu.dot_dimension_numbers<[1], [0], [0], [1], [0, 0, 1, 1], [], []>} : vector<8x288xbf16>, vector<288x64xbf16>, vector<8x64xf32> -> vector<8x64xf32>
    %7 = arith.addf %3, %6 : vector<8x64xf32>
    %c0_6 = arith.constant 0 : index
    %c0_7 = arith.constant 0 : index
    %8 = vector.load %arg7[%c0_6, %c0_7] : memref<8x64xf32, #tpu.memory_space<vmem>>, vector<8x64xf32>
    tpu.vector_store %arg7[%c0_6, %c0_7], %7 {strides = array<i32>} : memref<8x64xf32, #tpu.memory_space<vmem>>, vector<8x64xf32>,
    %c0_i32_8 = arith.constant 0 : i32
    %9 = arith.cmpi eq, %arg2, %c0_i32_8 : i32
    %10 = arith.extui %9 : i1 to i32
    %c0_i32_9 = arith.constant 0 : i32
    %11 = arith.cmpi ne, %10, %c0_i32_9 : i32
    scf.if %11 {
      %c0_10 = arith.constant 0 : index
      %c0_11 = arith.constant 0 : index
      %12 = vector.load %arg7[%c0_10, %c0_11] : memref<8x64xf32, #tpu.memory_space<vmem>>, vector<8x64xf32>
      %c0_12 = arith.constant 0 : index
      %c0_13 = arith.constant 0 : index
      %13 = vector.load %arg5[%c0_12, %c0_13] : memref<1x64xf32, #tpu.memory_space<vmem>>, vector<1x64xf32>
      %14 = vector.broadcast %13 : vector<1x64xf32> to vector<8x64xf32>
      %15 = arith.addf %12, %14 : vector<8x64xf32>
      %cst_14 = arith.constant 0.000000e+00 : f32
      %16 = vector.broadcast %cst_14 : f32 to vector<8x64xf32>
      %17 = arith.maximumf %15, %16 : vector<8x64xf32>
      %18 = arith.truncf %17 : vector<8x64xf32> to vector<8x64xbf16>
      %c0_15 = arith.constant 0 : index
      %c0_16 = arith.constant 0 : index
      %19 = vector.load %arg6[%c0_15, %c0_16] : memref<8x64xbf16, #tpu.memory_space<vmem>>, vector<8x64xbf16>
      tpu.vector_store %arg6[%c0_15, %c0_16], %18 {strides = array<i32>} : memref<8x64xbf16, #tpu.memory_space<vmem>>, vector<8x64xbf16>,
    } else {
    }
    return
  }
  func.func @transform_0(%arg0: i32, %arg1: i32, %arg2: i32) -> (i32, i32) {
    %c0_i32 = arith.constant 0 : i32
    return %arg0, %arg2 : i32, i32
  }
  func.func @transform_1(%arg0: i32, %arg1: i32, %arg2: i32) -> (i32, i32) {
    %c0_i32 = arith.constant 0 : i32
    return %arg2, %arg1 : i32, i32
  }
  func.func @transform_2(%arg0: i32, %arg1: i32, %arg2: i32) -> (i32, i32) {
    %c0_i32 = arith.constant 0 : i32
    %c0_i32_0 = arith.constant 0 : i32
    return %c0_i32, %arg1 : i32, i32
  }
  func.func @transform_3(%arg0: i32, %arg1: i32, %arg2: i32) -> (i32, i32) {
    %c0_i32 = arith.constant 0 : i32
    return %arg0, %arg1 : i32, i32
  }
}

module attributes {stable_mosaic.version = 11 : i64} {
  func.func @_matmul_bias_act_kernel(%arg0: i32, %arg1: i32, %arg2: i32, %arg3: memref<8x576xbf16, #tpu.memory_space<vmem>>, %arg4: memref<576x32xbf16, #tpu.memory_space<vmem>>, %arg5: memref<1x32xf32, #tpu.memory_space<vmem>>, %arg6: memref<8x32xbf16, #tpu.memory_space<vmem>>, %arg7: memref<8x32xf32, #tpu.memory_space<vmem>>) attributes {dimension_semantics = [#tpu.dimension_semantics<parallel>, #tpu.dimension_semantics<parallel>, #tpu.dimension_semantics<arbitrary>], iteration_bounds = array<i64: 1, 1, 1>, scalar_prefetch = 0 : i64, scratch_operands = 1 : i64, tpu.core_type = #tpu.core_type<tc>, window_params = [{transform_indices = @transform_0, window_bounds = array<i64: 8, 576>}, {transform_indices = @transform_1, window_bounds = array<i64: 576, 32>}, {transform_indices = @transform_2, window_bounds = array<i64: 1, 32>}, {transform_indices = @transform_3, window_bounds = array<i64: 8, 32>}]} {
    %c0_i32 = arith.constant 0 : i32
    %0 = arith.cmpi eq, %arg2, %c0_i32 : i32
    %1 = arith.extui %0 : i1 to i32
    %c0_i32_0 = arith.constant 0 : i32
    %2 = arith.cmpi ne, %1, %c0_i32_0 : i32
    scf.if %2 {
      %cst_10 = arith.constant 0.000000e+00 : f32
      %12 = vector.broadcast %cst_10 : f32 to vector<8x32xf32>
      %c0_11 = arith.constant 0 : index
      %c0_12 = arith.constant 0 : index
      %13 = vector.load %arg7[%c0_11, %c0_12] : memref<8x32xf32, #tpu.memory_space<vmem>>, vector<8x32xf32>
      tpu.vector_store %arg7[%c0_11, %c0_12], %12 {strides = array<i32>} : memref<8x32xf32, #tpu.memory_space<vmem>>, vector<8x32xf32>,
    } else {
    }
    %c0 = arith.constant 0 : index
    %c0_1 = arith.constant 0 : index
    %3 = vector.load %arg7[%c0, %c0_1] : memref<8x32xf32, #tpu.memory_space<vmem>>, vector<8x32xf32>
    %c0_2 = arith.constant 0 : index
    %c0_3 = arith.constant 0 : index
    %4 = vector.load %arg3[%c0_2, %c0_3] : memref<8x576xbf16, #tpu.memory_space<vmem>>, vector<8x576xbf16>
    %c0_4 = arith.constant 0 : index
    %c0_5 = arith.constant 0 : index
    %5 = vector.load %arg4[%c0_4, %c0_5] : memref<576x32xbf16, #tpu.memory_space<vmem>>, vector<576x32xbf16>
    %cst = arith.constant dense<0.000000e+00> : vector<8x32xf32>
    %6 = tpu.matmul %4, %5, %cst {dimension_numbers = #tpu.dot_dimension_numbers<[1], [0], [0], [1], [0, 0, 1, 1], [], []>} : vector<8x576xbf16>, vector<576x32xbf16>, vector<8x32xf32> -> vector<8x32xf32>
    %7 = arith.addf %3, %6 : vector<8x32xf32>
    %c0_6 = arith.constant 0 : index
    %c0_7 = arith.constant 0 : index
    %8 = vector.load %arg7[%c0_6, %c0_7] : memref<8x32xf32, #tpu.memory_space<vmem>>, vector<8x32xf32>
    tpu.vector_store %arg7[%c0_6, %c0_7], %7 {strides = array<i32>} : memref<8x32xf32, #tpu.memory_space<vmem>>, vector<8x32xf32>,
    %c0_i32_8 = arith.constant 0 : i32
    %9 = arith.cmpi eq, %arg2, %c0_i32_8 : i32
    %10 = arith.extui %9 : i1 to i32
    %c0_i32_9 = arith.constant 0 : i32
    %11 = arith.cmpi ne, %10, %c0_i32_9 : i32
    scf.if %11 {
      %c0_10 = arith.constant 0 : index
      %c0_11 = arith.constant 0 : index
      %12 = vector.load %arg7[%c0_10, %c0_11] : memref<8x32xf32, #tpu.memory_space<vmem>>, vector<8x32xf32>
      %c0_12 = arith.constant 0 : index
      %c0_13 = arith.constant 0 : index
      %13 = vector.load %arg5[%c0_12, %c0_13] : memref<1x32xf32, #tpu.memory_space<vmem>>, vector<1x32xf32>
      %14 = vector.broadcast %13 : vector<1x32xf32> to vector<8x32xf32>
      %15 = arith.addf %12, %14 : vector<8x32xf32>
      %cst_14 = arith.constant 0.000000e+00 : f32
      %16 = vector.broadcast %cst_14 : f32 to vector<8x32xf32>
      %17 = arith.maximumf %15, %16 : vector<8x32xf32>
      %18 = arith.truncf %17 : vector<8x32xf32> to vector<8x32xbf16>
      %c0_15 = arith.constant 0 : index
      %c0_16 = arith.constant 0 : index
      %19 = vector.load %arg6[%c0_15, %c0_16] : memref<8x32xbf16, #tpu.memory_space<vmem>>, vector<8x32xbf16>
      tpu.vector_store %arg6[%c0_15, %c0_16], %18 {strides = array<i32>} : memref<8x32xbf16, #tpu.memory_space<vmem>>, vector<8x32xbf16>,
    } else {
    }
    return
  }
  func.func @transform_0(%arg0: i32, %arg1: i32, %arg2: i32) -> (i32, i32) {
    %c0_i32 = arith.constant 0 : i32
    return %arg0, %arg2 : i32, i32
  }
  func.func @transform_1(%arg0: i32, %arg1: i32, %arg2: i32) -> (i32, i32) {
    %c0_i32 = arith.constant 0 : i32
    return %arg2, %arg1 : i32, i32
  }
  func.func @transform_2(%arg0: i32, %arg1: i32, %arg2: i32) -> (i32, i32) {
    %c0_i32 = arith.constant 0 : i32
    %c0_i32_0 = arith.constant 0 : i32
    return %c0_i32, %arg1 : i32, i32
  }
  func.func @transform_3(%arg0: i32, %arg1: i32, %arg2: i32) -> (i32, i32) {
    %c0_i32 = arith.constant 0 : i32
    return %arg0, %arg1 : i32, i32
  }
}

module attributes {stable_mosaic.version = 11 : i64} {
  func.func @_matmul_bias_act_kernel(%arg0: i32, %arg1: i32, %arg2: i32, %arg3: memref<8x32xbf16, #tpu.memory_space<vmem>>, %arg4: memref<32x64xbf16, #tpu.memory_space<vmem>>, %arg5: memref<1x64xf32, #tpu.memory_space<vmem>>, %arg6: memref<8x64xbf16, #tpu.memory_space<vmem>>, %arg7: memref<8x64xf32, #tpu.memory_space<vmem>>) attributes {dimension_semantics = [#tpu.dimension_semantics<parallel>, #tpu.dimension_semantics<parallel>, #tpu.dimension_semantics<arbitrary>], iteration_bounds = array<i64: 1, 1, 1>, scalar_prefetch = 0 : i64, scratch_operands = 1 : i64, tpu.core_type = #tpu.core_type<tc>, window_params = [{transform_indices = @transform_0, window_bounds = array<i64: 8, 32>}, {transform_indices = @transform_1, window_bounds = array<i64: 32, 64>}, {transform_indices = @transform_2, window_bounds = array<i64: 1, 64>}, {transform_indices = @transform_3, window_bounds = array<i64: 8, 64>}]} {
    %c0_i32 = arith.constant 0 : i32
    %0 = arith.cmpi eq, %arg2, %c0_i32 : i32
    %1 = arith.extui %0 : i1 to i32
    %c0_i32_0 = arith.constant 0 : i32
    %2 = arith.cmpi ne, %1, %c0_i32_0 : i32
    scf.if %2 {
      %cst_10 = arith.constant 0.000000e+00 : f32
      %12 = vector.broadcast %cst_10 : f32 to vector<8x64xf32>
      %c0_11 = arith.constant 0 : index
      %c0_12 = arith.constant 0 : index
      %13 = vector.load %arg7[%c0_11, %c0_12] : memref<8x64xf32, #tpu.memory_space<vmem>>, vector<8x64xf32>
      tpu.vector_store %arg7[%c0_11, %c0_12], %12 {strides = array<i32>} : memref<8x64xf32, #tpu.memory_space<vmem>>, vector<8x64xf32>,
    } else {
    }
    %c0 = arith.constant 0 : index
    %c0_1 = arith.constant 0 : index
    %3 = vector.load %arg7[%c0, %c0_1] : memref<8x64xf32, #tpu.memory_space<vmem>>, vector<8x64xf32>
    %c0_2 = arith.constant 0 : index
    %c0_3 = arith.constant 0 : index
    %4 = vector.load %arg3[%c0_2, %c0_3] : memref<8x32xbf16, #tpu.memory_space<vmem>>, vector<8x32xbf16>
    %c0_4 = arith.constant 0 : index
    %c0_5 = arith.constant 0 : index
    %5 = vector.load %arg4[%c0_4, %c0_5] : memref<32x64xbf16, #tpu.memory_space<vmem>>, vector<32x64xbf16>
    %cst = arith.constant dense<0.000000e+00> : vector<8x64xf32>
    %6 = tpu.matmul %4, %5, %cst {dimension_numbers = #tpu.dot_dimension_numbers<[1], [0], [0], [1], [0, 0, 1, 1], [], []>} : vector<8x32xbf16>, vector<32x64xbf16>, vector<8x64xf32> -> vector<8x64xf32>
    %7 = arith.addf %3, %6 : vector<8x64xf32>
    %c0_6 = arith.constant 0 : index
    %c0_7 = arith.constant 0 : index
    %8 = vector.load %arg7[%c0_6, %c0_7] : memref<8x64xf32, #tpu.memory_space<vmem>>, vector<8x64xf32>
    tpu.vector_store %arg7[%c0_6, %c0_7], %7 {strides = array<i32>} : memref<8x64xf32, #tpu.memory_space<vmem>>, vector<8x64xf32>,
    %c0_i32_8 = arith.constant 0 : i32
    %9 = arith.cmpi eq, %arg2, %c0_i32_8 : i32
    %10 = arith.extui %9 : i1 to i32
    %c0_i32_9 = arith.constant 0 : i32
    %11 = arith.cmpi ne, %10, %c0_i32_9 : i32
    scf.if %11 {
      %c0_10 = arith.constant 0 : index
      %c0_11 = arith.constant 0 : index
      %12 = vector.load %arg7[%c0_10, %c0_11] : memref<8x64xf32, #tpu.memory_space<vmem>>, vector<8x64xf32>
      %c0_12 = arith.constant 0 : index
      %c0_13 = arith.constant 0 : index
      %13 = vector.load %arg5[%c0_12, %c0_13] : memref<1x64xf32, #tpu.memory_space<vmem>>, vector<1x64xf32>
      %14 = vector.broadcast %13 : vector<1x64xf32> to vector<8x64xf32>
      %15 = arith.addf %12, %14 : vector<8x64xf32>
      %cst_14 = arith.constant 0.000000e+00 : f32
      %16 = vector.broadcast %cst_14 : f32 to vector<8x64xf32>
      %17 = arith.maximumf %15, %16 : vector<8x64xf32>
      %18 = arith.truncf %17 : vector<8x64xf32> to vector<8x64xbf16>
      %c0_15 = arith.constant 0 : index
      %c0_16 = arith.constant 0 : index
      %19 = vector.load %arg6[%c0_15, %c0_16] : memref<8x64xbf16, #tpu.memory_space<vmem>>, vector<8x64xbf16>
      tpu.vector_store %arg6[%c0_15, %c0_16], %18 {strides = array<i32>} : memref<8x64xbf16, #tpu.memory_space<vmem>>, vector<8x64xbf16>,
    } else {
    }
    return
  }
  func.func @transform_0(%arg0: i32, %arg1: i32, %arg2: i32) -> (i32, i32) {
    %c0_i32 = arith.constant 0 : i32
    return %arg0, %arg2 : i32, i32
  }
  func.func @transform_1(%arg0: i32, %arg1: i32, %arg2: i32) -> (i32, i32) {
    %c0_i32 = arith.constant 0 : i32
    return %arg2, %arg1 : i32, i32
  }
  func.func @transform_2(%arg0: i32, %arg1: i32, %arg2: i32) -> (i32, i32) {
    %c0_i32 = arith.constant 0 : i32
    %c0_i32_0 = arith.constant 0 : i32
    return %c0_i32, %arg1 : i32, i32
  }
  func.func @transform_3(%arg0: i32, %arg1: i32, %arg2: i32) -> (i32, i32) {
    %c0_i32 = arith.constant 0 : i32
    return %arg0, %arg1 : i32, i32
  }
}

module attributes {stable_mosaic.version = 11 : i64} {
  func.func @_matmul_bias_act_kernel(%arg0: i32, %arg1: i32, %arg2: i32, %arg3: memref<8x16xbf16, #tpu.memory_space<vmem>>, %arg4: memref<16x32xbf16, #tpu.memory_space<vmem>>, %arg5: memref<1x32xf32, #tpu.memory_space<vmem>>, %arg6: memref<8x32xbf16, #tpu.memory_space<vmem>>, %arg7: memref<8x32xf32, #tpu.memory_space<vmem>>) attributes {dimension_semantics = [#tpu.dimension_semantics<parallel>, #tpu.dimension_semantics<parallel>, #tpu.dimension_semantics<arbitrary>], iteration_bounds = array<i64: 1, 1, 1>, scalar_prefetch = 0 : i64, scratch_operands = 1 : i64, tpu.core_type = #tpu.core_type<tc>, window_params = [{transform_indices = @transform_0, window_bounds = array<i64: 8, 16>}, {transform_indices = @transform_1, window_bounds = array<i64: 16, 32>}, {transform_indices = @transform_2, window_bounds = array<i64: 1, 32>}, {transform_indices = @transform_3, window_bounds = array<i64: 8, 32>}]} {
    %c0_i32 = arith.constant 0 : i32
    %0 = arith.cmpi eq, %arg2, %c0_i32 : i32
    %1 = arith.extui %0 : i1 to i32
    %c0_i32_0 = arith.constant 0 : i32
    %2 = arith.cmpi ne, %1, %c0_i32_0 : i32
    scf.if %2 {
      %cst_10 = arith.constant 0.000000e+00 : f32
      %12 = vector.broadcast %cst_10 : f32 to vector<8x32xf32>
      %c0_11 = arith.constant 0 : index
      %c0_12 = arith.constant 0 : index
      %13 = vector.load %arg7[%c0_11, %c0_12] : memref<8x32xf32, #tpu.memory_space<vmem>>, vector<8x32xf32>
      tpu.vector_store %arg7[%c0_11, %c0_12], %12 {strides = array<i32>} : memref<8x32xf32, #tpu.memory_space<vmem>>, vector<8x32xf32>,
    } else {
    }
    %c0 = arith.constant 0 : index
    %c0_1 = arith.constant 0 : index
    %3 = vector.load %arg7[%c0, %c0_1] : memref<8x32xf32, #tpu.memory_space<vmem>>, vector<8x32xf32>
    %c0_2 = arith.constant 0 : index
    %c0_3 = arith.constant 0 : index
    %4 = vector.load %arg3[%c0_2, %c0_3] : memref<8x16xbf16, #tpu.memory_space<vmem>>, vector<8x16xbf16>
    %c0_4 = arith.constant 0 : index
    %c0_5 = arith.constant 0 : index
    %5 = vector.load %arg4[%c0_4, %c0_5] : memref<16x32xbf16, #tpu.memory_space<vmem>>, vector<16x32xbf16>
    %cst = arith.constant dense<0.000000e+00> : vector<8x32xf32>
    %6 = tpu.matmul %4, %5, %cst {dimension_numbers = #tpu.dot_dimension_numbers<[1], [0], [0], [1], [0, 0, 1, 1], [], []>} : vector<8x16xbf16>, vector<16x32xbf16>, vector<8x32xf32> -> vector<8x32xf32>
    %7 = arith.addf %3, %6 : vector<8x32xf32>
    %c0_6 = arith.constant 0 : index
    %c0_7 = arith.constant 0 : index
    %8 = vector.load %arg7[%c0_6, %c0_7] : memref<8x32xf32, #tpu.memory_space<vmem>>, vector<8x32xf32>
    tpu.vector_store %arg7[%c0_6, %c0_7], %7 {strides = array<i32>} : memref<8x32xf32, #tpu.memory_space<vmem>>, vector<8x32xf32>,
    %c0_i32_8 = arith.constant 0 : i32
    %9 = arith.cmpi eq, %arg2, %c0_i32_8 : i32
    %10 = arith.extui %9 : i1 to i32
    %c0_i32_9 = arith.constant 0 : i32
    %11 = arith.cmpi ne, %10, %c0_i32_9 : i32
    scf.if %11 {
      %c0_10 = arith.constant 0 : index
      %c0_11 = arith.constant 0 : index
      %12 = vector.load %arg7[%c0_10, %c0_11] : memref<8x32xf32, #tpu.memory_space<vmem>>, vector<8x32xf32>
      %c0_12 = arith.constant 0 : index
      %c0_13 = arith.constant 0 : index
      %13 = vector.load %arg5[%c0_12, %c0_13] : memref<1x32xf32, #tpu.memory_space<vmem>>, vector<1x32xf32>
      %14 = vector.broadcast %13 : vector<1x32xf32> to vector<8x32xf32>
      %15 = arith.addf %12, %14 : vector<8x32xf32>
      %cst_14 = arith.constant 0.000000e+00 : f32
      %16 = vector.broadcast %cst_14 : f32 to vector<8x32xf32>
      %17 = arith.maximumf %15, %16 : vector<8x32xf32>
      %18 = arith.truncf %17 : vector<8x32xf32> to vector<8x32xbf16>
      %c0_15 = arith.constant 0 : index
      %c0_16 = arith.constant 0 : index
      %19 = vector.load %arg6[%c0_15, %c0_16] : memref<8x32xbf16, #tpu.memory_space<vmem>>, vector<8x32xbf16>
      tpu.vector_store %arg6[%c0_15, %c0_16], %18 {strides = array<i32>} : memref<8x32xbf16, #tpu.memory_space<vmem>>, vector<8x32xbf16>,
    } else {
    }
    return
  }
  func.func @transform_0(%arg0: i32, %arg1: i32, %arg2: i32) -> (i32, i32) {
    %c0_i32 = arith.constant 0 : i32
    return %arg0, %arg2 : i32, i32
  }
  func.func @transform_1(%arg0: i32, %arg1: i32, %arg2: i32) -> (i32, i32) {
    %c0_i32 = arith.constant 0 : i32
    return %arg2, %arg1 : i32, i32
  }
  func.func @transform_2(%arg0: i32, %arg1: i32, %arg2: i32) -> (i32, i32) {
    %c0_i32 = arith.constant 0 : i32
    %c0_i32_0 = arith.constant 0 : i32
    return %c0_i32, %arg1 : i32, i32
  }
  func.func @transform_3(%arg0: i32, %arg1: i32, %arg2: i32) -> (i32, i32) {
    %c0_i32 = arith.constant 0 : i32
    return %arg0, %arg1 : i32, i32
  }
}

module attributes {stable_mosaic.version = 11 : i64} {
  func.func @_matmul_bias_act_kernel(%arg0: i32, %arg1: i32, %arg2: i32, %arg3: memref<32x8xbf16, #tpu.memory_space<vmem>>, %arg4: memref<8x16xbf16, #tpu.memory_space<vmem>>, %arg5: memref<1x16xf32, #tpu.memory_space<vmem>>, %arg6: memref<32x16xbf16, #tpu.memory_space<vmem>>, %arg7: memref<32x16xf32, #tpu.memory_space<vmem>>) attributes {dimension_semantics = [#tpu.dimension_semantics<parallel>, #tpu.dimension_semantics<parallel>, #tpu.dimension_semantics<arbitrary>], iteration_bounds = array<i64: 1, 1, 1>, scalar_prefetch = 0 : i64, scratch_operands = 1 : i64, tpu.core_type = #tpu.core_type<tc>, window_params = [{transform_indices = @transform_0, window_bounds = array<i64: 32, 8>}, {transform_indices = @transform_1, window_bounds = array<i64: 8, 16>}, {transform_indices = @transform_2, window_bounds = array<i64: 1, 16>}, {transform_indices = @transform_3, window_bounds = array<i64: 32, 16>}]} {
    %c0_i32 = arith.constant 0 : i32
    %0 = arith.cmpi eq, %arg2, %c0_i32 : i32
    %1 = arith.extui %0 : i1 to i32
    %c0_i32_0 = arith.constant 0 : i32
    %2 = arith.cmpi ne, %1, %c0_i32_0 : i32
    scf.if %2 {
      %cst_10 = arith.constant 0.000000e+00 : f32
      %12 = vector.broadcast %cst_10 : f32 to vector<32x16xf32>
      %c0_11 = arith.constant 0 : index
      %c0_12 = arith.constant 0 : index
      %13 = vector.load %arg7[%c0_11, %c0_12] : memref<32x16xf32, #tpu.memory_space<vmem>>, vector<32x16xf32>
      tpu.vector_store %arg7[%c0_11, %c0_12], %12 {strides = array<i32>} : memref<32x16xf32, #tpu.memory_space<vmem>>, vector<32x16xf32>,
    } else {
    }
    %c0 = arith.constant 0 : index
    %c0_1 = arith.constant 0 : index
    %3 = vector.load %arg7[%c0, %c0_1] : memref<32x16xf32, #tpu.memory_space<vmem>>, vector<32x16xf32>
    %c0_2 = arith.constant 0 : index
    %c0_3 = arith.constant 0 : index
    %4 = vector.load %arg3[%c0_2, %c0_3] : memref<32x8xbf16, #tpu.memory_space<vmem>>, vector<32x8xbf16>
    %c0_4 = arith.constant 0 : index
    %c0_5 = arith.constant 0 : index
    %5 = vector.load %arg4[%c0_4, %c0_5] : memref<8x16xbf16, #tpu.memory_space<vmem>>, vector<8x16xbf16>
    %cst = arith.constant dense<0.000000e+00> : vector<32x16xf32>
    %6 = tpu.matmul %4, %5, %cst {dimension_numbers = #tpu.dot_dimension_numbers<[1], [0], [0], [1], [0, 0, 1, 1], [], []>} : vector<32x8xbf16>, vector<8x16xbf16>, vector<32x16xf32> -> vector<32x16xf32>
    %7 = arith.addf %3, %6 : vector<32x16xf32>
    %c0_6 = arith.constant 0 : index
    %c0_7 = arith.constant 0 : index
    %8 = vector.load %arg7[%c0_6, %c0_7] : memref<32x16xf32, #tpu.memory_space<vmem>>, vector<32x16xf32>
    tpu.vector_store %arg7[%c0_6, %c0_7], %7 {strides = array<i32>} : memref<32x16xf32, #tpu.memory_space<vmem>>, vector<32x16xf32>,
    %c0_i32_8 = arith.constant 0 : i32
    %9 = arith.cmpi eq, %arg2, %c0_i32_8 : i32
    %10 = arith.extui %9 : i1 to i32
    %c0_i32_9 = arith.constant 0 : i32
    %11 = arith.cmpi ne, %10, %c0_i32_9 : i32
    scf.if %11 {
      %c0_10 = arith.constant 0 : index
      %c0_11 = arith.constant 0 : index
      %12 = vector.load %arg7[%c0_10, %c0_11] : memref<32x16xf32, #tpu.memory_space<vmem>>, vector<32x16xf32>
      %c0_12 = arith.constant 0 : index
      %c0_13 = arith.constant 0 : index
      %13 = vector.load %arg5[%c0_12, %c0_13] : memref<1x16xf32, #tpu.memory_space<vmem>>, vector<1x16xf32>
      %14 = vector.broadcast %13 : vector<1x16xf32> to vector<32x16xf32>
      %15 = arith.addf %12, %14 : vector<32x16xf32>
      %cst_14 = arith.constant 0.000000e+00 : f32
      %16 = vector.broadcast %cst_14 : f32 to vector<32x16xf32>
      %17 = arith.maximumf %15, %16 : vector<32x16xf32>
      %18 = arith.truncf %17 : vector<32x16xf32> to vector<32x16xbf16>
      %c0_15 = arith.constant 0 : index
      %c0_16 = arith.constant 0 : index
      %19 = vector.load %arg6[%c0_15, %c0_16] : memref<32x16xbf16, #tpu.memory_space<vmem>>, vector<32x16xbf16>
      tpu.vector_store %arg6[%c0_15, %c0_16], %18 {strides = array<i32>} : memref<32x16xbf16, #tpu.memory_space<vmem>>, vector<32x16xbf16>,
    } else {
    }
    return
  }
  func.func @transform_0(%arg0: i32, %arg1: i32, %arg2: i32) -> (i32, i32) {
    %c0_i32 = arith.constant 0 : i32
    return %arg0, %arg2 : i32, i32
  }
  func.func @transform_1(%arg0: i32, %arg1: i32, %arg2: i32) -> (i32, i32) {
    %c0_i32 = arith.constant 0 : i32
    return %arg2, %arg1 : i32, i32
  }
  func.func @transform_2(%arg0: i32, %arg1: i32, %arg2: i32) -> (i32, i32) {
    %c0_i32 = arith.constant 0 : i32
    %c0_i32_0 = arith.constant 0 : i32
    return %c0_i32, %arg1 : i32, i32
  }
  func.func @transform_3(%arg0: i32, %arg1: i32, %arg2: i32) -> (i32, i32) {
    %c0_i32 = arith.constant 0 : i32
    return %arg0, %arg1 : i32, i32
  }
}

module attributes {stable_mosaic.version = 11 : i64} {
  func.func @_matmul_bias_act_kernel(%arg0: i32, %arg1: i32, %arg2: i32, %arg3: memref<128x4xbf16, #tpu.memory_space<vmem>>, %arg4: memref<4x4xbf16, #tpu.memory_space<vmem>>, %arg5: memref<1x4xf32, #tpu.memory_space<vmem>>, %arg6: memref<128x4xf32, #tpu.memory_space<vmem>>, %arg7: memref<128x4xf32, #tpu.memory_space<vmem>>) attributes {dimension_semantics = [#tpu.dimension_semantics<parallel>, #tpu.dimension_semantics<parallel>, #tpu.dimension_semantics<arbitrary>], iteration_bounds = array<i64: 1, 1, 1>, scalar_prefetch = 0 : i64, scratch_operands = 1 : i64, tpu.core_type = #tpu.core_type<tc>, window_params = [{transform_indices = @transform_0, window_bounds = array<i64: 128, 4>}, {transform_indices = @transform_1, window_bounds = array<i64: 4, 4>}, {transform_indices = @transform_2, window_bounds = array<i64: 1, 4>}, {transform_indices = @transform_3, window_bounds = array<i64: 128, 4>}]} {
    %c0_i32 = arith.constant 0 : i32
    %0 = arith.cmpi eq, %arg2, %c0_i32 : i32
    %1 = arith.extui %0 : i1 to i32
    %c0_i32_0 = arith.constant 0 : i32
    %2 = arith.cmpi ne, %1, %c0_i32_0 : i32
    scf.if %2 {
      %cst_10 = arith.constant 0.000000e+00 : f32
      %12 = vector.broadcast %cst_10 : f32 to vector<128x4xf32>
      %c0_11 = arith.constant 0 : index
      %c0_12 = arith.constant 0 : index
      %13 = vector.load %arg7[%c0_11, %c0_12] : memref<128x4xf32, #tpu.memory_space<vmem>>, vector<128x4xf32>
      tpu.vector_store %arg7[%c0_11, %c0_12], %12 {strides = array<i32>} : memref<128x4xf32, #tpu.memory_space<vmem>>, vector<128x4xf32>,
    } else {
    }
    %c0 = arith.constant 0 : index
    %c0_1 = arith.constant 0 : index
    %3 = vector.load %arg7[%c0, %c0_1] : memref<128x4xf32, #tpu.memory_space<vmem>>, vector<128x4xf32>
    %c0_2 = arith.constant 0 : index
    %c0_3 = arith.constant 0 : index
    %4 = vector.load %arg3[%c0_2, %c0_3] : memref<128x4xbf16, #tpu.memory_space<vmem>>, vector<128x4xbf16>
    %c0_4 = arith.constant 0 : index
    %c0_5 = arith.constant 0 : index
    %5 = vector.load %arg4[%c0_4, %c0_5] : memref<4x4xbf16, #tpu.memory_space<vmem>>, vector<4x4xbf16>
    %cst = arith.constant dense<0.000000e+00> : vector<128x4xf32>
    %6 = tpu.matmul %4, %5, %cst {dimension_numbers = #tpu.dot_dimension_numbers<[1], [0], [0], [1], [0, 0, 1, 1], [], []>} : vector<128x4xbf16>, vector<4x4xbf16>, vector<128x4xf32> -> vector<128x4xf32>
    %7 = arith.addf %3, %6 : vector<128x4xf32>
    %c0_6 = arith.constant 0 : index
    %c0_7 = arith.constant 0 : index
    %8 = vector.load %arg7[%c0_6, %c0_7] : memref<128x4xf32, #tpu.memory_space<vmem>>, vector<128x4xf32>
    tpu.vector_store %arg7[%c0_6, %c0_7], %7 {strides = array<i32>} : memref<128x4xf32, #tpu.memory_space<vmem>>, vector<128x4xf32>,
    %c0_i32_8 = arith.constant 0 : i32
    %9 = arith.cmpi eq, %arg2, %c0_i32_8 : i32
    %10 = arith.extui %9 : i1 to i32
    %c0_i32_9 = arith.constant 0 : i32
    %11 = arith.cmpi ne, %10, %c0_i32_9 : i32
    scf.if %11 {
      %c0_10 = arith.constant 0 : index
      %c0_11 = arith.constant 0 : index
      %12 = vector.load %arg7[%c0_10, %c0_11] : memref<128x4xf32, #tpu.memory_space<vmem>>, vector<128x4xf32>
      %c0_12 = arith.constant 0 : index
      %c0_13 = arith.constant 0 : index
      %13 = vector.load %arg5[%c0_12, %c0_13] : memref<1x4xf32, #tpu.memory_space<vmem>>, vector<1x4xf32>
      %14 = vector.broadcast %13 : vector<1x4xf32> to vector<128x4xf32>
      %15 = arith.addf %12, %14 : vector<128x4xf32>
      %16 = math.tanh %15 : vector<128x4xf32>
      %c0_14 = arith.constant 0 : index
      %c0_15 = arith.constant 0 : index
      %17 = vector.load %arg6[%c0_14, %c0_15] : memref<128x4xf32, #tpu.memory_space<vmem>>, vector<128x4xf32>
      tpu.vector_store %arg6[%c0_14, %c0_15], %16 {strides = array<i32>} : memref<128x4xf32, #tpu.memory_space<vmem>>, vector<128x4xf32>,
    } else {
    }
    return
  }
  func.func @transform_0(%arg0: i32, %arg1: i32, %arg2: i32) -> (i32, i32) {
    %c0_i32 = arith.constant 0 : i32
    return %arg0, %arg2 : i32, i32
  }
  func.func @transform_1(%arg0: i32, %arg1: i32, %arg2: i32) -> (i32, i32) {
    %c0_i32 = arith.constant 0 : i32
    return %arg2, %arg1 : i32, i32
  }
  func.func @transform_2(%arg0: i32, %arg1: i32, %arg2: i32) -> (i32, i32) {
    %c0_i32 = arith.constant 0 : i32
    %c0_i32_0 = arith.constant 0 : i32
    return %c0_i32, %arg1 : i32, i32
  }
  func.func @transform_3(%arg0: i32, %arg1: i32, %arg2: i32) -> (i32, i32) {
    %c0_i32 = arith.constant 0 : i32
    return %arg0, %arg1 : i32, i32
  }
}

</mosaic_0001>

<bundles_post_ra>
// kernel: _forward.10
= control target key start
LH: loop header
LB: loop body
LE: loop exit
PB: predicated region body
PF: predicated region fallthrough
CT: control target
= control target key end

     0   :  { %vm19_vm0 = vcmask 31744   ;;  %v518_v1 = vmov 0.0   ;;  %vm124_vm1 = vcmask 261120   ;;  %vm401_vm2 = vcmask 27648   ;;  %s694_s1 = inlined_call_operand.vmem [shape: bf16[32,4], index: 1, kind: input, shape index: {}]   ;;  %s695_s0 = inlined_call_operand.vmem [shape: bf16[128,32], index: 0, kind: input, shape index: {}]   ;;  %s696_s2 = inlined_call_operand.vmem [shape: f32[1,4], index: 2, kind: input, shape index: {}]   ;;  %s697_s3 = inlined_call_operand.vmem [shape: bf16[128,4], index: 3, kind: output, shape index: {}]  }
   0x1   :  { %v508_v0 = vld [vmem:[%s694_s1] sm:$0xff]   ;;  %22 = vst.msk [vmem:[#allocation2 + $0x10] sm:$0xff] %vm19_vm0, %v518_v1  ;;  %20 = vst.msk [vmem:[#allocation2] sm:$0xff] %vm19_vm0, %v518_v1  ;;  %v509_v2 = vld [vmem:[%s694_s1 + $0x8] sm:$0xff]  }
   0x2   :  { %21 = vst.msk [vmem:[#allocation2 + $0x8] sm:$0xff] %vm19_vm0, %v518_v1  ;;  %23 = vst.msk [vmem:[#allocation2 + $0x18] sm:$0xff] %vm19_vm0, %v518_v1  ;;  %483 = vmatprep.subr.bf16.mxu0 %v508_v0  ;;  %503 = vmatprep.subr.bf16.mxu1 %v508_v0  ;;  %v510_v3 = vld [vmem:[%s695_s0] sm:$0xff]   ;;  %v512_v5 = vld [vmem:[%s695_s0 + $0x8] sm:$0xff]  }
   0x3   :  { %24 = vst.msk [vmem:[#allocation2 + $0x20] sm:$0xff] %vm19_vm0, %v518_v1  ;;  %25 = vst.msk [vmem:[#allocation2 + $0x28] sm:$0xff] %vm19_vm0, %v518_v1  ;;  %484 = vmatpush3.bf16.msra.mxu0 %v508_v0  ;;  %505 = vmatpush3.bf16.msra.mxu1 %v508_v0  ;;  %v511_v4 = vld [vmem:[%s695_s0 + $0x20] sm:$0xff]   ;;  %v513_v6 = vld [vmem:[%s695_s0 + $0x28] sm:$0xff]  }
   0x4   :  { %26 = vst.msk [vmem:[#allocation2 + $0x30] sm:$0xff] %vm19_vm0, %v518_v1  ;;  %27 = vst.msk [vmem:[#allocation2 + $0x38] sm:$0xff] %vm19_vm0, %v518_v1  ;;  %485 = vmatprep.subr.bf16.mxu0 %v509_v2  ;;  %504 = vmatprep.subr.bf16.mxu1 %v509_v2  ;;  %v514_v7 = vld [vmem:[%s695_s0 + $0x10] sm:$0xff]   ;;  %v516_v9 = vld [vmem:[%s695_s0 + $0x18] sm:$0xff]  }
   0x5   :  { %28 = vst.msk [vmem:[#allocation2 + $0x40] sm:$0xff] %vm19_vm0, %v518_v1  ;;  %29 = vst.msk [vmem:[#allocation2 + $0x48] sm:$0xff] %vm19_vm0, %v518_v1  ;;  %487 = vmatprep.mubr.msk.bf16.mxu0 %vm124_vm1, %v510_v3  ;;  %495 = vmatprep.mubr.msk.bf16.mxu1 %vm124_vm1, %v511_v4  ;;  %v515_v8 = vld [vmem:[%s695_s0 + $0x30] sm:$0xff]   ;;  %v517_v10 = vld [vmem:[%s695_s0 + $0x38] sm:$0xff]  }
   0x6   :  { %30 = vst.msk [vmem:[#allocation2 + $0x50] sm:$0xff] %vm19_vm0, %v518_v1  ;;  %31 = vst.msk [vmem:[#allocation2 + $0x58] sm:$0xff] %vm19_vm0, %v518_v1  ;;  %v604_v39 = vld [vmem:[%s696_s2] ss:$0 sm:$0xff] }
   0x7   :  { %32 = vst.msk [vmem:[#allocation2 + $0x60] sm:$0xff] %vm19_vm0, %v518_v1  ;;  %33 = vst.msk [vmem:[#allocation2 + $0x68] sm:$0xff] %vm19_vm0, %v518_v1  ;;  %486 = vmatpush3.bf16.msra.mxu0 %v509_v2  ;;  %506 = vmatpush3.bf16.msra.mxu1 %v509_v2 }
   0x8   :  { %34 = vst.msk [vmem:[#allocation2 + $0x70] sm:$0xff] %vm19_vm0, %v518_v1  ;;  %35 = vst.msk [vmem:[#allocation2 + $0x78] sm:$0xff] %vm19_vm0, %v518_v1  ;;  %v38_v11 = vld [vmem:[#allocation2 + $0x10] sm:$0xff]  ;;  %v36_v13 = vld [vmem:[#allocation2] sm:$0xff] }
   0x9   :  { %v39_v17 = vld [vmem:[#allocation2 + $0x18] sm:$0xff]  ;;  %v37_v23 = vld [vmem:[#allocation2 + $0x8] sm:$0xff] }
   0xa   :  { %488 = vmatmul.mubr.msk.bf16.vlgmr.msra.gmra.mrb[0].mxu0 %vm124_vm1, %v512_v5  ;;  %496 = vmatmul.mubr.msk.bf16.vlgmr.msra.gmra.mrb[0].mxu1 %vm124_vm1, %v513_v6  ;;  %v40_v37 = vld [vmem:[#allocation2 + $0x20] sm:$0xff]  ;;  %v41_v48 = vld [vmem:[#allocation2 + $0x28] sm:$0xff] }
   0xb   :  { %491 = vmatprep.mubr.msk.bf16.mxu0 %vm124_vm1, %v514_v7  ;;  %499 = vmatprep.mubr.msk.bf16.mxu1 %vm124_vm1, %v515_v8  ;;  %v42_v35 = vld [vmem:[#allocation2 + $0x30] sm:$0xff]  ;;  %v43_v42 = vld [vmem:[#allocation2 + $0x38] sm:$0xff] }
   0xc   :  { %v44_v14 = vld [vmem:[#allocation2 + $0x40] sm:$0xff]  ;;  %v45_v24 = vld [vmem:[#allocation2 + $0x48] sm:$0xff] }
   0xd   :  { %v46_v12 = vld [vmem:[#allocation2 + $0x50] sm:$0xff]  ;;  %v47_v18 = vld [vmem:[#allocation2 + $0x58] sm:$0xff] }
   0xe   :  { %v48_v38 = vld [vmem:[#allocation2 + $0x60] sm:$0xff]  ;;  %v49_v49 = vld [vmem:[#allocation2 + $0x68] sm:$0xff] }
   0xf   :  { %v50_v36 = vld [vmem:[#allocation2 + $0x70] sm:$0xff]  ;;  %v51_v43 = vld [vmem:[#allocation2 + $0x78] sm:$0xff] }
  0x12   :  { %492 = vmatmul.mubr.msk.bf16.gmra.mrb[4].mxu0 %vm124_vm1, %v516_v9  ;;  %500 = vmatmul.mubr.msk.bf16.gmra.mrb[4].mxu1 %vm124_vm1, %v517_v10 }
  0xdd   :  { %v489_v15 = vpop.f32.mrb[0].mxu0  ;;  %v497_v16 = vpop.f32.mrb[0].mxu1 }
  0xde   :  { %v248_v19 = vadd.f32 %v489_v15, %v38_v11  ;;  %v256_v20 = vadd.f32 %v497_v16, %v46_v12  ;;  %v183_v21 = vpop.f32.mrb[1].mxu0  ;;  %v215_v22 = vpop.f32.mrb[1].mxu1 }
  0xdf   :  { %v246_v25 = vadd.f32 %v183_v21, %v36_v13  ;;  %v254_v26 = vadd.f32 %v215_v22, %v44_v14  ;;  %v490_v27 = vpop.f32.mrb[2].mxu0  ;;  %v498_v28 = vpop.f32.mrb[2].mxu1 }
  0xe0   :  { %265 = vst.msk [vmem:[#allocation2 + $0x10] sm:$0xff] %vm19_vm0, %v248_v19  ;;  %273 = vst.msk [vmem:[#allocation2 + $0x50] sm:$0xff] %vm19_vm0, %v256_v20  ;;  %v249_v29 = vadd.f32 %v490_v27, %v39_v17  ;;  %v257_v30 = vadd.f32 %v498_v28, %v47_v18  ;;  %v186_v31 = vpop.f32.mrb[3].mxu0  ;;  %v218_v32 = vpop.f32.mrb[3].mxu1 }
  0xe1   :  { %263 = vst.msk [vmem:[#allocation2] sm:$0xff] %vm19_vm0, %v246_v25  ;;  %271 = vst.msk [vmem:[#allocation2 + $0x40] sm:$0xff] %vm19_vm0, %v254_v26  ;;  %v247_v33 = vadd.f32 %v186_v31, %v37_v23  ;;  %v255_v34 = vadd.f32 %v218_v32, %v45_v24 }
  0xe2   :  { %266 = vst.msk [vmem:[#allocation2 + $0x18] sm:$0xff] %vm19_vm0, %v249_v29  ;;  %274 = vst.msk [vmem:[#allocation2 + $0x58] sm:$0xff] %vm19_vm0, %v257_v30 }
  0xe3   :  { %264 = vst.msk [vmem:[#allocation2 + $0x8] sm:$0xff] %vm19_vm0, %v247_v33  ;;  %272 = vst.msk [vmem:[#allocation2 + $0x48] sm:$0xff] %vm19_vm0, %v255_v34 }
  0xe5   :  { %v493_v40 = vpop.f32.mrb[4].mxu0  ;;  %v501_v41 = vpop.f32.mrb[4].mxu1 }
  0xe6   :  { %v252_v44 = vadd.f32 %v493_v40, %v42_v35  ;;  %v260_v45 = vadd.f32 %v501_v41, %v50_v36  ;;  %v199_v46 = vpop.f32.mrb[5].mxu0  ;;  %v231_v47 = vpop.f32.mrb[5].mxu1 }
  0xe7   :  { %v284_v50 = vld [vmem:[#allocation2 + $0x10] sm:$0xff]  ;;  %v250_v52 = vadd.f32 %v199_v46, %v40_v37  ;;  %v258_v53 = vadd.f32 %v231_v47, %v48_v38  ;;  %v494_v54 = vpop.f32.mrb[6].mxu0  ;;  %v502_v55 = vpop.f32.mrb[6].mxu1 }
  0xe8   :  { %v292_v51 = vld [vmem:[#allocation2 + $0x50] sm:$0xff]  ;;  %v307_v56 = vadd.f32 %v604_v39, %v284_v50  ;;  %v282_v58 = vld [vmem:[#allocation2] sm:$0xff]  ;;  %269 = vst.msk [vmem:[#allocation2 + $0x30] sm:$0xff] %vm19_vm0, %v252_v44  ;;  %277 = vst.msk [vmem:[#allocation2 + $0x70] sm:$0xff] %vm19_vm0, %v260_v45  ;;  %v253_v60 = vadd.f32 %v494_v54, %v43_v42  ;;  %v261_v61 = vadd.f32 %v502_v55, %v51_v43  ;;  %v202_v62 = vpop.f32.mrb[7].mxu0  ;;  %v234_v63 = vpop.f32.mrb[7].mxu1 }
  0xe9   :  { %v315_v57 = vadd.f32 %v604_v39, %v292_v51  ;;  %v290_v59 = vld [vmem:[#allocation2 + $0x40] sm:$0xff]  ;;  %v305_v0 = vadd.f32 %v604_v39, %v282_v58  ;;  %v285_v2 = vld [vmem:[#allocation2 + $0x18] sm:$0xff]  ;;  %267 = vst.msk [vmem:[#allocation2 + $0x20] sm:$0xff] %vm19_vm0, %v250_v52  ;;  %275 = vst.msk [vmem:[#allocation2 + $0x60] sm:$0xff] %vm19_vm0, %v258_v53  ;;  %v251_v4 = vadd.f32 %v202_v62, %v41_v48 }
  0xea   :  { %v313_v1 = vadd.f32 %v604_v39, %v290_v59  ;;  %v293_v3 = vld [vmem:[#allocation2 + $0x58] sm:$0xff]  ;;  %v259_v5 = vadd.f32 %v234_v63, %v49_v49  ;;  %v323_v6 = vmax.f32 %v307_v56, 0.0  ;;  %v308_v8 = vadd.f32 %v604_v39, %v285_v2  ;;  %v283_v10 = vld [vmem:[#allocation2 + $0x8] sm:$0xff]  ;;  %270 = vst.msk [vmem:[#allocation2 + $0x38] sm:$0xff] %vm19_vm0, %v253_v60  ;;  %278 = vst.msk [vmem:[#allocation2 + $0x78] sm:$0xff] %vm19_vm0, %v261_v61 }
  0xeb   :  { %v331_v7 = vmax.f32 %v315_v57, 0.0  ;;  %v316_v9 = vadd.f32 %v604_v39, %v293_v3  ;;  %v291_v11 = vld [vmem:[#allocation2 + $0x48] sm:$0xff]  ;;  %v321_v12 = vmax.f32 %v305_v0, 0.0  ;;  %v306_v14 = vadd.f32 %v604_v39, %v283_v10  ;;  %268 = vst.msk [vmem:[#allocation2 + $0x28] sm:$0xff] %vm19_vm0, %v251_v4 }
  0xec   :  { %v329_v13 = vmax.f32 %v313_v1, 0.0  ;;  %v314_v15 = vadd.f32 %v604_v39, %v291_v11  ;;  %276 = vst.msk [vmem:[#allocation2 + $0x68] sm:$0xff] %vm19_vm0, %v259_v5  ;;  %v459_v16 = vpack.c.bf16 %v323_v6, %v323_v6  ;;  %v324_v18 = vmax.f32 %v308_v8, 0.0 }
  0xed   :  { %v467_v17 = vpack.c.bf16 %v331_v7, %v331_v7  ;;  %v332_v19 = vmax.f32 %v316_v9, 0.0  ;;  %v457_v20 = vpack.c.bf16 %v321_v12, %v321_v12  ;;  %v322_v22 = vmax.f32 %v306_v14, 0.0 }
  0xee   :  { %v465_v21 = vpack.c.bf16 %v329_v13, %v329_v13  ;;  %v330_v23 = vmax.f32 %v314_v15, 0.0  ;;  %404 = vst.msk [vmem:[%s697_s3 + $0x8] sm:$0xf] %vm401_vm2, %v459_v16  ;;  %v460_v24 = vpack.c.bf16 %v324_v18, %v324_v18 }
  0xef   :  { %412 = vst.msk [vmem:[%s697_s3 + $0x28] sm:$0xf] %vm401_vm2, %v467_v17  ;;  %v468_v25 = vpack.c.bf16 %v332_v19, %v332_v19  ;;  %402 = vst.msk [vmem:[%s697_s3] sm:$0xf] %vm401_vm2, %v457_v20  ;;  %v458_v26 = vpack.c.bf16 %v322_v22, %v322_v22  ;;  %v288_v28 = vld [vmem:[#allocation2 + $0x30] sm:$0xff] }
  0xf0   :  { %410 = vst.msk [vmem:[%s697_s3 + $0x20] sm:$0xf] %vm401_vm2, %v465_v21  ;;  %v466_v27 = vpack.c.bf16 %v330_v23, %v330_v23  ;;  %v296_v29 = vld [vmem:[#allocation2 + $0x70] sm:$0xff]  ;;  %405 = vst.msk [vmem:[%s697_s3 + $0xc] sm:$0xf] %vm401_vm2, %v460_v24  ;;  %v311_v30 = vadd.f32 %v604_v39, %v288_v28  ;;  %v286_v32 = vld [vmem:[#allocation2 + $0x20] sm:$0xff] }
  0xf1   :  { %413 = vst.msk [vmem:[%s697_s3 + $0x2c] sm:$0xf] %vm401_vm2, %v468_v25  ;;  %v319_v31 = vadd.f32 %v604_v39, %v296_v29  ;;  %v294_v33 = vld [vmem:[#allocation2 + $0x60] sm:$0xff]  ;;  %403 = vst.msk [vmem:[%s697_s3 + $0x4] sm:$0xf] %vm401_vm2, %v458_v26  ;;  %v309_v34 = vadd.f32 %v604_v39, %v286_v32  ;;  %v289_v36 = vld [vmem:[#allocation2 + $0x38] sm:$0xff] }
  0xf2   :  { %411 = vst.msk [vmem:[%s697_s3 + $0x24] sm:$0xf] %vm401_vm2, %v466_v27  ;;  %v317_v35 = vadd.f32 %v604_v39, %v294_v33  ;;  %v297_v37 = vld [vmem:[#allocation2 + $0x78] sm:$0xff]  ;;  %v327_v38 = vmax.f32 %v311_v30, 0.0  ;;  %v312_v41 = vadd.f32 %v604_v39, %v289_v36  ;;  %v287_v43 = vld [vmem:[#allocation2 + $0x28] sm:$0xff] }
  0xf3   :  { %v335_v40 = vmax.f32 %v319_v31, 0.0  ;;  %v320_v42 = vadd.f32 %v604_v39, %v297_v37  ;;  %v295_v44 = vld [vmem:[#allocation2 + $0x68] sm:$0xff]  ;;  %v325_v45 = vmax.f32 %v309_v34, 0.0  ;;  %v310_v47 = vadd.f32 %v604_v39, %v287_v43 }
  0xf4   :  { %v333_v46 = vmax.f32 %v317_v35, 0.0  ;;  %v318_v48 = vadd.f32 %v604_v39, %v295_v44  ;;  %v463_v49 = vpack.c.bf16 %v327_v38, %v327_v38  ;;  %v328_v51 = vmax.f32 %v312_v41, 0.0 }
  0xf5   :  { %v471_v50 = vpack.c.bf16 %v335_v40, %v335_v40  ;;  %v336_v52 = vmax.f32 %v320_v42, 0.0  ;;  %v461_v53 = vpack.c.bf16 %v325_v45, %v325_v45  ;;  %v326_v55 = vmax.f32 %v310_v47, 0.0 }
  0xf6   :  { %v469_v54 = vpack.c.bf16 %v333_v46, %v333_v46  ;;  %v334_v56 = vmax.f32 %v318_v48, 0.0  ;;  %408 = vst.msk [vmem:[%s697_s3 + $0x18] sm:$0xf] %vm401_vm2, %v463_v49  ;;  %v464_v57 = vpack.c.bf16 %v328_v51, %v328_v51 }
  0xf7   :  { %416 = vst.msk [vmem:[%s697_s3 + $0x38] sm:$0xf] %vm401_vm2, %v471_v50  ;;  %v472_v39 = vpack.c.bf16 %v336_v52, %v336_v52  ;;  %406 = vst.msk [vmem:[%s697_s3 + $0x10] sm:$0xf] %vm401_vm2, %v461_v53  ;;  %v462_v58 = vpack.c.bf16 %v326_v55, %v326_v55 }
  0xf8   :  { %414 = vst.msk [vmem:[%s697_s3 + $0x30] sm:$0xf] %vm401_vm2, %v469_v54  ;;  %v470_v59 = vpack.c.bf16 %v334_v56, %v334_v56  ;;  %409 = vst.msk [vmem:[%s697_s3 + $0x1c] sm:$0xf] %vm401_vm2, %v464_v57 }
  0xf9   :  { %417 = vst.msk [vmem:[%s697_s3 + $0x3c] sm:$0xf] %vm401_vm2, %v472_v39  ;;  %407 = vst.msk [vmem:[%s697_s3 + $0x14] sm:$0xf] %vm401_vm2, %v462_v58 }
  0xfa   :  { %415 = vst.msk [vmem:[%s697_s3 + $0x34] sm:$0xf] %vm401_vm2, %v470_v59 }

// kernel: _forward.11
= control target key start
LH: loop header
LB: loop body
LE: loop exit
PB: predicated region body
PF: predicated region fallthrough
CT: control target
= control target key end

     0   :  { %vm19_vm0 = vcmask 64512   ;;  %v228_v1 = vmov 0.0   ;;  %vm74_vm1 = vcmask 523264   ;;  %vm177_vm2 = vcmask 60416   ;;  %s290_s1 = inlined_call_operand.vmem [shape: bf16[64,8], index: 1, kind: input, shape index: {}]   ;;  %s291_s0 = inlined_call_operand.vmem [shape: bf16[32,64], index: 0, kind: input, shape index: {}]   ;;  %s292_s2 = inlined_call_operand.vmem [shape: f32[1,8], index: 2, kind: input, shape index: {}]   ;;  %s293_s3 = inlined_call_operand.vmem [shape: bf16[32,8], index: 3, kind: output, shape index: {}]  }
   0x1   :  { %v222_v0 = vld [vmem:[%s290_s1] sm:$0xff]   ;;  %22 = vst.msk [vmem:[#allocation2 + $0x10] sm:$0xff] %vm19_vm0, %v228_v1  ;;  %20 = vst.msk [vmem:[#allocation2] sm:$0xff] %vm19_vm0, %v228_v1  ;;  %v223_v2 = vld [vmem:[%s290_s1 + $0x8] sm:$0xff]  }
   0x2   :  { %21 = vst.msk [vmem:[#allocation2 + $0x8] sm:$0xff] %vm19_vm0, %v228_v1  ;;  %23 = vst.msk [vmem:[#allocation2 + $0x18] sm:$0xff] %vm19_vm0, %v228_v1  ;;  %209 = vmatprep.subr.bf16.mxu0 %v222_v0  ;;  %v224_v3 = vld [vmem:[%s290_s1 + $0x10] sm:$0xff]   ;;  %v226_v4 = vld [vmem:[%s291_s0] sm:$0xff]  }
   0x3   :  { %210 = vmatpush3.bf16.msra.mxu0 %v222_v0  ;;  %217 = vmatprep.mubr.msk.bf16.mxu0 %vm74_vm1, %v226_v4  ;;  %v225_v5 = vld [vmem:[%s290_s1 + $0x18] sm:$0xff]   ;;  %v227_v6 = vld [vmem:[%s291_s0 + $0x8] sm:$0xff]   ;;  %v194_v19 = vld [vmem:[%s292_s2] ss:$0 sm:$0xff] }
   0x4   :  { %211 = vmatprep.subr.bf16.mxu0 %v223_v2 }
   0x7   :  { %212 = vmatpush3.bf16.msra.mxu0 %v223_v2 }
   0x8   :  { %213 = vmatprep.subr.bf16.mxu0 %v224_v3  ;;  %v26_v7 = vld [vmem:[#allocation2 + $0x10] sm:$0xff]  ;;  %v24_v8 = vld [vmem:[#allocation2] sm:$0xff] }
   0x9   :  { %v27_v10 = vld [vmem:[#allocation2 + $0x18] sm:$0xff]  ;;  %v25_v13 = vld [vmem:[#allocation2 + $0x8] sm:$0xff] }
   0xb   :  { %214 = vmatpush3.bf16.msra.mxu0 %v224_v3 }
   0xc   :  { %215 = vmatprep.subr.bf16.mxu0 %v225_v5 }
   0xf   :  { %216 = vmatpush3.bf16.msra.mxu0 %v225_v5 }
  0x12   :  { %218 = vmatmul.mubr.msk.bf16.vlgmr.msra.gmra.mrb[0].mxu0 %vm74_vm1, %v227_v6 }
  0xe5   :  { %v219_v9 = vpop.f32.mrb[0].mxu0 }
  0xe6   :  { %v132_v11 = vadd.f32 %v219_v9, %v26_v7  ;;  %v115_v12 = vpop.f32.mrb[1].mxu0 }
  0xe7   :  { %v130_v14 = vadd.f32 %v115_v12, %v24_v8  ;;  %v220_v15 = vpop.f32.mrb[2].mxu0 }
  0xe8   :  { %137 = vst.msk [vmem:[#allocation2 + $0x10] sm:$0xff] %vm19_vm0, %v132_v11  ;;  %v133_v16 = vadd.f32 %v220_v15, %v27_v10  ;;  %v118_v17 = vpop.f32.mrb[3].mxu0 }
  0xe9   :  { %135 = vst.msk [vmem:[#allocation2] sm:$0xff] %vm19_vm0, %v130_v14  ;;  %v131_v18 = vadd.f32 %v118_v17, %v25_v13 }
  0xea   :  { %138 = vst.msk [vmem:[#allocation2 + $0x18] sm:$0xff] %vm19_vm0, %v133_v16 }
  0xeb   :  { %136 = vst.msk [vmem:[#allocation2 + $0x8] sm:$0xff] %vm19_vm0, %v131_v18 }
  0xef   :  { %v144_v20 = vld [vmem:[#allocation2 + $0x10] sm:$0xff] }
  0xf0   :  { %v155_v21 = vadd.f32 %v194_v19, %v144_v20  ;;  %v142_v22 = vld [vmem:[#allocation2] sm:$0xff] }
  0xf1   :  { %v153_v23 = vadd.f32 %v194_v19, %v142_v22  ;;  %v145_v24 = vld [vmem:[#allocation2 + $0x18] sm:$0xff] }
  0xf2   :  { %v159_v25 = vmax.f32 %v155_v21, 0.0  ;;  %v156_v26 = vadd.f32 %v194_v19, %v145_v24  ;;  %v143_v27 = vld [vmem:[#allocation2 + $0x8] sm:$0xff] }
  0xf3   :  { %v157_v28 = vmax.f32 %v153_v23, 0.0  ;;  %v154_v29 = vadd.f32 %v194_v19, %v143_v27 }
  0xf4   :  { %v201_v30 = vpack.c.bf16 %v159_v25, %v159_v25  ;;  %v160_v31 = vmax.f32 %v156_v26, 0.0 }
  0xf5   :  { %v199_v32 = vpack.c.bf16 %v157_v28, %v157_v28  ;;  %v158_v33 = vmax.f32 %v154_v29, 0.0 }
  0xf6   :  { %180 = vst.msk [vmem:[%s293_s3 + $0x8] sm:$0xf] %vm177_vm2, %v201_v30  ;;  %v202_v34 = vpack.c.bf16 %v160_v31, %v160_v31 }
  0xf7   :  { %178 = vst.msk [vmem:[%s293_s3] sm:$0xf] %vm177_vm2, %v199_v32  ;;  %v200_v35 = vpack.c.bf16 %v158_v33, %v158_v33 }
  0xf8   :  { %181 = vst.msk [vmem:[%s293_s3 + $0xc] sm:$0xf] %vm177_vm2, %v202_v34 }
  0xf9   :  { %179 = vst.msk [vmem:[%s293_s3 + $0x4] sm:$0xf] %vm177_vm2, %v200_v35 }

// kernel: _forward.12
= control target key start
LH: loop header
LB: loop body
LE: loop exit
PB: predicated region body
PF: predicated region fallthrough
CT: control target
= control target key end

     0   :  { %vm19_vm0 = vcmask 130048   ;;  %v198_v0 = vmov 0.0   ;;  %vm199_vm1 = vmmov 0   ;;  %vm144_vm2 = vcmask 125952   ;;  %s255_s1 = inlined_call_operand.vmem [shape: bf16[128,16], index: 1, kind: input, shape index: {}]   ;;  %s256_s0 = inlined_call_operand.vmem [shape: bf16[8,128], index: 0, kind: input, shape index: {}]   ;;  %s257_s2 = inlined_call_operand.vmem [shape: f32[1,16], index: 2, kind: input, shape index: {}]   ;;  %s258_s3 = inlined_call_operand.vmem [shape: bf16[8,16], index: 3, kind: output, shape index: {}]  }
   0x1   :  { %168 = vmatprep.subr.bf16.mxu0 %v198_v0  ;;  %v190_v1 = vld [vmem:[%s255_s1] sm:$0xff]   ;;  %184 = vmatprep.mubr.msk.bf16.mxu0 %vm199_vm1, %v198_v0  ;;  %20 = vst.msk [vmem:[#allocation2] sm:$0xff] %vm19_vm0, %v198_v0  ;;  %v191_v2 = vld [vmem:[%s255_s1 + $0x8] sm:$0xff]   ;;  %v192_v3 = vld [vmem:[%s255_s1 + $0x10] sm:$0xff]  }
   0x2   :  { %169 = vmatpush3.bf16.msra.mxu0 %v190_v1  ;;  %v193_v4 = vld [vmem:[%s255_s1 + $0x18] sm:$0xff]   ;;  %v194_v5 = vld [vmem:[%s255_s1 + $0x20] sm:$0xff]   ;;  %v195_v6 = vld [vmem:[%s255_s1 + $0x28] sm:$0xff]  }
   0x3   :  { %170 = vmatprep.subr.bf16.mxu0 %v198_v0  ;;  %v196_v7 = vld [vmem:[%s255_s1 + $0x30] sm:$0xff]   ;;  %v197_v8 = vld [vmem:[%s255_s1 + $0x38] sm:$0xff]   ;;  %v22_v9 = vld [vmem:[%s256_s0] sm:$0xf] }
   0x4   :  { %v158_v16 = vld [vmem:[%s257_s2] ss:$0 sm:$0xff] }
   0x6   :  { %171 = vmatpush3.bf16.msra.mxu0 %v191_v2 }
   0x7   :  { %172 = vmatprep.subr.bf16.mxu0 %v198_v0 }
   0x8   :  { %v21_v10 = vld [vmem:[#allocation2] sm:$0xff] }
   0xa   :  { %173 = vmatpush3.bf16.msra.mxu0 %v192_v3 }
   0xb   :  { %174 = vmatprep.subr.bf16.mxu0 %v198_v0 }
   0xe   :  { %175 = vmatpush3.bf16.msra.mxu0 %v193_v4 }
   0xf   :  { %176 = vmatprep.subr.bf16.mxu0 %v198_v0 }
  0x12   :  { %177 = vmatpush3.bf16.msra.mxu0 %v194_v5 }
  0x13   :  { %178 = vmatprep.subr.bf16.mxu0 %v198_v0 }
  0x16   :  { %179 = vmatpush3.bf16.msra.mxu0 %v195_v6 }
  0x17   :  { %180 = vmatprep.subr.bf16.mxu0 %v198_v0 }
  0x1a   :  { %181 = vmatpush3.bf16.msra.mxu0 %v196_v7 }
  0x1b   :  { %182 = vmatprep.subr.bf16.mxu0 %v198_v0 }
  0x1e   :  { %183 = vmatpush3.bf16.msra.mxu0 %v197_v8 }
  0x21   :  { %185 = vmatmul.mubr.bf16.vlgmr.msra.gmra.mrb[0].mxu0 %v22_v9 }
  0xf4   :  { %v121_v11 = vpop.f32.mrb[0].mxu0 }
  0xf5   :  { %v127_v12 = vadd.f32 %v121_v11, %v21_v10  ;;  %v186_v13 = vpop.f32.mrb[1].mxu0 }
  0xf6   :  { %v124_v14 = vpop.f32.mrb[2].mxu0 }
  0xf7   :  { %129 = vst.msk [vmem:[#allocation2] sm:$0xff] %vm19_vm0, %v127_v12  ;;  %v187_v15 = vpop.f32.mrb[3].mxu0 }
  0xfe   :  { %v133_v17 = vld [vmem:[#allocation2] sm:$0xff] }
  0xff   :  { %v141_v18 = vadd.f32 %v158_v16, %v133_v17 }
 0x101   :  { %v142_v19 = vmax.f32 %v141_v18, 0.0 }
 0x103   :  { %v143_v20 = vpack.c.bf16 %v142_v19, %v142_v19 }
 0x105   :  { %145 = vst.msk [vmem:[%s258_s3] sm:$0xf] %vm144_vm2, %v143_v20 }

// kernel: _forward.13
= control target key start
LH: loop header
LB: loop body
LE: loop exit
PB: predicated region body
PF: predicated region fallthrough
CT: control target
= control target key end

     0   :  { %vm19_vm0 = vcmask 261120   ;;  %v281_v19 = vmov 0.0   ;;  %vm215_vm1 = vcmask 257024   ;;  %s359_s1 = inlined_call_operand.vmem [shape: bf16[256,32], index: 1, kind: input, shape index: {}]   ;;  %s360_s0 = inlined_call_operand.vmem [shape: bf16[8,256], index: 0, kind: input, shape index: {}]   ;;  %s361_s2 = inlined_call_operand.vmem [shape: f32[1,32], index: 2, kind: input, shape index: {}]   ;;  %s362_s3 = inlined_call_operand.vmem [shape: bf16[8,32], index: 3, kind: output, shape index: {}]  }
   0x1   :  { %v263_v0 = vld [vmem:[%s359_s1 + $0x40] sm:$0xff]   ;;  %v265_v2 = vld [vmem:[%s359_s1 + $0x48] sm:$0xff]   ;;  %v267_v4 = vld [vmem:[%s359_s1 + $0x50] sm:$0xff]   ;;  %20 = vst.msk [vmem:[#allocation2] sm:$0xff] %vm19_vm0, %v281_v19 }
   0x2   :  { %v264_v1 = vld [vmem:[%s359_s1] sm:$0xff]   ;;  %240 = vmatprep.subr.bf16.mxu0 %v263_v0  ;;  %v266_v3 = vld [vmem:[%s359_s1 + $0x8] sm:$0xff]   ;;  %v268_v5 = vld [vmem:[%s359_s1 + $0x10] sm:$0xff]  }
   0x3   :  { %241 = vmatpush3.bf16.msra.mxu0 %v264_v1  ;;  %v269_v6 = vld [vmem:[%s359_s1 + $0x58] sm:$0xff]   ;;  %v271_v8 = vld [vmem:[%s359_s1 + $0x60] sm:$0xff]   ;;  %v273_v10 = vld [vmem:[%s359_s1 + $0x68] sm:$0xff]  }
   0x4   :  { %242 = vmatprep.subr.bf16.mxu0 %v265_v2  ;;  %v270_v7 = vld [vmem:[%s359_s1 + $0x18] sm:$0xff]   ;;  %v272_v9 = vld [vmem:[%s359_s1 + $0x20] sm:$0xff]   ;;  %v274_v13 = vld [vmem:[%s359_s1 + $0x28] sm:$0xff]  }
   0x5   :  { %v22_v11 = vld [vmem:[%s360_s0] sm:$0xff]  ;;  %v275_v14 = vld [vmem:[%s359_s1 + $0x70] sm:$0xff]   ;;  %v277_v16 = vld [vmem:[%s359_s1 + $0x78] sm:$0xff]  }
   0x6   :  { %v222_v12 = vcombine.high %v22_v11, %v22_v11  ;;  %v276_v15 = vld [vmem:[%s359_s1 + $0x30] sm:$0xff]   ;;  %v278_v17 = vld [vmem:[%s359_s1 + $0x38] sm:$0xff]   ;;  %v221_v18 = vcombine.low %v22_v11, %v22_v11  ;;  %v239_v27 = vld [vmem:[%s361_s2] ss:$0 sm:$0xff] }
   0x7   :  { %243 = vmatpush3.bf16.msra.mxu0 %v266_v3 }
   0x8   :  { %244 = vmatprep.subr.bf16.mxu0 %v267_v4  ;;  %190 = vmatprep.mubr.bf16.mxu0 %v222_v12  ;;  %v21_v21 = vld [vmem:[#allocation2] sm:$0xff] }
   0xb   :  { %245 = vmatpush3.bf16.msra.mxu0 %v268_v5 }
   0xc   :  { %246 = vmatprep.subr.bf16.mxu0 %v269_v6 }
   0xf   :  { %247 = vmatpush3.bf16.msra.mxu0 %v270_v7 }
  0x10   :  { %248 = vmatprep.subr.bf16.mxu0 %v271_v8 }
  0x13   :  { %249 = vmatpush3.bf16.msra.mxu0 %v272_v9 }
  0x14   :  { %250 = vmatprep.subr.bf16.mxu0 %v273_v10 }
  0x17   :  { %251 = vmatpush3.bf16.msra.mxu0 %v274_v13 }
  0x18   :  { %252 = vmatprep.subr.bf16.mxu0 %v275_v14 }
  0x1b   :  { %253 = vmatpush3.bf16.msra.mxu0 %v276_v15 }
  0x1c   :  { %254 = vmatprep.subr.bf16.mxu0 %v277_v16 }
  0x1f   :  { %255 = vmatpush3.bf16.msra.mxu0 %v278_v17 }
  0x22   :  { %191 = vmatmul.mubr.bf16.vlgmr.msra.gmra.mrb[0].mxu0 %v221_v18 }
  0xf5   :  { %v256_v20 = vpop.f32.mrb[0].mxu0 }
  0xf6   :  { %v257_v22 = vpop.f32.mrb[1].mxu0 }
  0xf7   :  { %v258_v23 = vadd.f32 %v257_v22, %v256_v20  ;;  %v259_v24 = vpop.f32.mrb[2].mxu0 }
  0xf8   :  { %v260_v25 = vpop.f32.mrb[3].mxu0 }
  0xf9   :  { %v198_v26 = vadd.f32 %v258_v23, %v21_v21 }
  0xfb   :  { %200 = vst.msk [vmem:[#allocation2] sm:$0xff] %vm19_vm0, %v198_v26 }
 0x102   :  { %v204_v28 = vld [vmem:[#allocation2] sm:$0xff] }
 0x103   :  { %v212_v29 = vadd.f32 %v239_v27, %v204_v28 }
 0x105   :  { %v213_v30 = vmax.f32 %v212_v29, 0.0 }
 0x107   :  { %v214_v31 = vpack.c.bf16 %v213_v30, %v213_v30 }
 0x109   :  { %216 = vst.msk [vmem:[%s362_s3] sm:$0xf] %vm215_vm1, %v214_v31 }

// kernel: _forward.14
= control target key start
LH: loop header
LB: loop body
LE: loop exit
PB: predicated region body
PF: predicated region fallthrough
CT: control target
= control target key end

     0   :  { %vm19_vm0 = vcmask 523264   ;;  %v364_v1 = vmov 0.0   ;;  %vm365_vm1 = vmmov 0   ;;  %vm178_vm2 = vcmask 261120   ;;  %s454_s1 = inlined_call_operand.vmem [shape: bf16[288,64], index: 1, kind: input, shape index: {}]   ;;  %s455_s0 = inlined_call_operand.vmem [shape: bf16[8,288], index: 0, kind: input, shape index: {}]   ;;  %s456_s2 = inlined_call_operand.vmem [shape: f32[1,64], index: 2, kind: input, shape index: {}]   ;;  %s457_s3 = inlined_call_operand.vmem [shape: bf16[8,64], index: 3, kind: output, shape index: {}]  }
   0x1   :  { %v343_v0 = vld [vmem:[%s454_s1 + $0x40] sm:$0xff]   ;;  %20 = vst.msk [vmem:[#allocation2] sm:$0xff] %vm19_vm0, %v364_v1  ;;  %333 = vmatprep.subr.bf16.mxu1 %v364_v1  ;;  %337 = vmatprep.mubr.msk.bf16.mxu1 %vm365_vm1, %v364_v1  ;;  %v345_v3 = vld [vmem:[%s454_s1 + $0x48] sm:$0xff]   ;;  %v347_v5 = vld [vmem:[%s454_s1 + $0x50] sm:$0xff]   ;;  %vm279_vm3 = vcmask 519168  }
   0x2   :  { %v344_v2 = vld [vmem:[%s454_s1] sm:$0xff]   ;;  %308 = vmatprep.subr.bf16.mxu0 %v343_v0  ;;  %v346_v4 = vld [vmem:[%s454_s1 + $0x8] sm:$0xff]   ;;  %v348_v6 = vld [vmem:[%s454_s1 + $0x10] sm:$0xff]  }
   0x3   :  { %309 = vmatpush3.bf16.msra.mxu0 %v344_v2  ;;  %v349_v7 = vld [vmem:[%s454_s1 + $0x58] sm:$0xff]   ;;  %v351_v9 = vld [vmem:[%s454_s1 + $0x60] sm:$0xff]   ;;  %v353_v12 = vld [vmem:[%s454_s1 + $0x68] sm:$0xff]  }
   0x4   :  { %310 = vmatprep.subr.bf16.mxu0 %v345_v3  ;;  %v350_v8 = vld [vmem:[%s454_s1 + $0x18] sm:$0xff]   ;;  %v357_v10 = vld [vmem:[%s454_s1 + $0x80] sm:$0xff]   ;;  %v360_v13 = vld [vmem:[%s454_s1 + $0x88] sm:$0xff]  }
   0x5   :  { %v352_v11 = vld [vmem:[%s454_s1 + $0x20] sm:$0xff]   ;;  %334 = vmatpush3.bf16.msra.mxu1 %v357_v10  ;;  %v354_v15 = vld [vmem:[%s454_s1 + $0x28] sm:$0xff]   ;;  %v355_v18 = vld [vmem:[%s454_s1 + $0x70] sm:$0xff]  }
   0x6   :  { %335 = vmatprep.subr.bf16.mxu1 %v364_v1  ;;  %v22_v14 = vld [vmem:[%s455_s0] sm:$0xff]  ;;  %v363_v17 = vld [vmem:[%s455_s0 + $0x8] ss:$0 sps:$4 sm:$0xff]   ;;  %v356_v19 = vld [vmem:[%s454_s1 + $0x30] sm:$0xff]  }
   0x7   :  { %311 = vmatpush3.bf16.msra.mxu0 %v346_v4  ;;  %v286_v16 = vcombine.high %v22_v14, %v22_v14  ;;  %v358_v20 = vld [vmem:[%s454_s1 + $0x78] sm:$0xff]   ;;  %v285_v22 = vcombine.low %v22_v14, %v22_v14  ;;  %v307_v35 = vld [vmem:[%s456_s2] ss:$0 sm:$0xff] }
   0x8   :  { %312 = vmatprep.subr.bf16.mxu0 %v347_v5  ;;  %v359_v21 = vld [vmem:[%s454_s1 + $0x38] sm:$0xff]   ;;  %v21_v31 = vld [vmem:[#allocation2] sm:$0xff] }
   0x9   :  { %336 = vmatpush3.bf16.msra.mxu1 %v360_v13  ;;  %214 = vmatprep.mubr.bf16.mxu0 %v286_v16 }
   0xb   :  { %313 = vmatpush3.bf16.msra.mxu0 %v348_v6 }
   0xc   :  { %314 = vmatprep.subr.bf16.mxu0 %v349_v7  ;;  %338 = vmatmul.mubr.msk.bf16.vlgmr.msra.gmra.mrb[0].mxu1 %vm178_vm2, %v363_v17 }
   0xf   :  { %315 = vmatpush3.bf16.msra.mxu0 %v350_v8 }
  0x10   :  { %316 = vmatprep.subr.bf16.mxu0 %v351_v9 }
  0x13   :  { %317 = vmatpush3.bf16.msra.mxu0 %v352_v11 }
  0x14   :  { %318 = vmatprep.subr.bf16.mxu0 %v353_v12 }
  0x17   :  { %319 = vmatpush3.bf16.msra.mxu0 %v354_v15 }
  0x18   :  { %320 = vmatprep.subr.bf16.mxu0 %v355_v18 }
  0x1b   :  { %321 = vmatpush3.bf16.msra.mxu0 %v356_v19 }
  0x1c   :  { %322 = vmatprep.subr.bf16.mxu0 %v358_v20 }
  0x1f   :  { %323 = vmatpush3.bf16.msra.mxu0 %v359_v21 }
  0x22   :  { %215 = vmatmul.mubr.bf16.vlgmr.msra.gmra.mrb[0].mxu0 %v285_v22 }
  0xdf   :  { %v256_v23 = vpop.f32.mrb[0].mxu1 }
  0xe0   :  { %v339_v24 = vpop.f32.mrb[1].mxu1 }
  0xe1   :  { %v259_v25 = vpop.f32.mrb[2].mxu1 }
  0xe2   :  { %v340_v26 = vpop.f32.mrb[3].mxu1 }
  0xf5   :  { %v324_v27 = vpop.f32.mrb[0].mxu0 }
  0xf6   :  { %v325_v28 = vpop.f32.mrb[1].mxu0 }
  0xf7   :  { %v326_v29 = vadd.f32 %v325_v28, %v324_v27  ;;  %v327_v30 = vpop.f32.mrb[2].mxu0 }
  0xf8   :  { %v328_v32 = vpop.f32.mrb[3].mxu0 }
  0xf9   :  { %v257_v33 = vadd.f32 %v326_v29, %v256_v23 }
  0xfb   :  { %v262_v34 = vadd.f32 %v257_v33, %v21_v31 }
  0xfd   :  { %264 = vst.msk [vmem:[#allocation2] sm:$0xff] %vm19_vm0, %v262_v34 }
 0x104   :  { %v268_v36 = vld [vmem:[#allocation2] sm:$0xff] }
 0x105   :  { %v276_v37 = vadd.f32 %v307_v35, %v268_v36 }
 0x107   :  { %v277_v38 = vmax.f32 %v276_v37, 0.0 }
 0x109   :  { %v278_v39 = vpack.c.bf16 %v277_v38, %v277_v38 }
 0x10b   :  { %280 = vst.msk [vmem:[%s457_s3] sm:$0xf] %vm279_vm3, %v278_v39 }

// kernel: _forward.16
= control target key start
LH: loop header
LB: loop body
LE: loop exit
PB: predicated region body
PF: predicated region fallthrough
CT: control target
= control target key end

     0   :  { %vm19_vm0 = vcmask 523264   ;;  %v125_v0 = vmov 0.0   ;;  %vm126_vm1 = vmmov 0   ;;  %vm39_vm2 = vcmask 261120   ;;  %s164_s1 = inlined_call_operand.vmem [shape: bf16[32,64], index: 1, kind: input, shape index: {}]   ;;  %s165_s0 = inlined_call_operand.vmem [shape: bf16[8,32], index: 0, kind: input, shape index: {}]   ;;  %s166_s2 = inlined_call_operand.vmem [shape: f32[1,64], index: 2, kind: input, shape index: {}]   ;;  %s167_s3 = inlined_call_operand.vmem [shape: bf16[8,64], index: 3, kind: output, shape index: {}]  }
   0x1   :  { %20 = vst.msk [vmem:[#allocation2] sm:$0xff] %vm19_vm0, %v125_v0  ;;  %113 = vmatprep.subr.bf16.mxu0 %v125_v0  ;;  %v123_v1 = vld [vmem:[%s164_s1] sm:$0xff]   ;;  %117 = vmatprep.mubr.msk.bf16.mxu0 %vm126_vm1, %v125_v0  ;;  %v124_v2 = vld [vmem:[%s164_s1 + $0x8] sm:$0xff]   ;;  %vm100_vm3 = vcmask 519168  }
   0x2   :  { %114 = vmatpush3.bf16.msra.mxu0 %v123_v1  ;;  %v22_v3 = vld [vmem:[%s165_s0] sm:$0xf] }
   0x3   :  { %115 = vmatprep.subr.bf16.mxu0 %v125_v0  ;;  %v109_v10 = vld [vmem:[%s166_s2] ss:$0 sm:$0xff] }
   0x6   :  { %116 = vmatpush3.bf16.msra.mxu0 %v124_v2 }
   0x8   :  { %v21_v4 = vld [vmem:[#allocation2] sm:$0xff] }
   0x9   :  { %118 = vmatmul.mubr.msk.bf16.vlgmr.msra.gmra.mrb[0].mxu0 %vm39_vm2, %v22_v3 }
  0xdc   :  { %v77_v5 = vpop.f32.mrb[0].mxu0 }
  0xdd   :  { %v83_v6 = vadd.f32 %v77_v5, %v21_v4  ;;  %v119_v7 = vpop.f32.mrb[1].mxu0 }
  0xde   :  { %v80_v8 = vpop.f32.mrb[2].mxu0 }
  0xdf   :  { %85 = vst.msk [vmem:[#allocation2] sm:$0xff] %vm19_vm0, %v83_v6  ;;  %v120_v9 = vpop.f32.mrb[3].mxu0 }
  0xe6   :  { %v89_v11 = vld [vmem:[#allocation2] sm:$0xff] }
  0xe7   :  { %v97_v12 = vadd.f32 %v109_v10, %v89_v11 }
  0xe9   :  { %v98_v13 = vmax.f32 %v97_v12, 0.0 }
  0xeb   :  { %v99_v14 = vpack.c.bf16 %v98_v13, %v98_v13 }
  0xed   :  { %101 = vst.msk [vmem:[%s167_s3] sm:$0xf] %vm100_vm3, %v99_v14 }

// kernel: _forward.17
= control target key start
LH: loop header
LB: loop body
LE: loop exit
PB: predicated region body
PF: predicated region fallthrough
CT: control target
= control target key end

     0   :  { %vm19_vm0 = vcmask 261120   ;;  %v112_v0 = vmov 0.0   ;;  %vm113_vm1 = vmmov 0   ;;  %vm31_vm2 = vcmask 130048   ;;  %s148_s1 = inlined_call_operand.vmem [shape: bf16[16,32], index: 1, kind: input, shape index: {}]   ;;  %s149_s0 = inlined_call_operand.vmem [shape: bf16[8,16], index: 0, kind: input, shape index: {}]   ;;  %s150_s2 = inlined_call_operand.vmem [shape: f32[1,32], index: 2, kind: input, shape index: {}]   ;;  %s151_s3 = inlined_call_operand.vmem [shape: bf16[8,32], index: 3, kind: output, shape index: {}]  }
   0x1   :  { %20 = vst.msk [vmem:[#allocation2] sm:$0xff] %vm19_vm0, %v112_v0  ;;  %103 = vmatprep.subr.bf16.mxu0 %v112_v0  ;;  %v111_v1 = vld [vmem:[%s148_s1] sm:$0xff]   ;;  %105 = vmatprep.mubr.msk.bf16.mxu0 %vm113_vm1, %v112_v0  ;;  %vm92_vm3 = vcmask 257024  }
   0x2   :  { %104 = vmatpush3.bf16.msra.mxu0 %v111_v1  ;;  %v22_v2 = vld [vmem:[%s149_s0] sm:$0xf] }
   0x3   :  { %v100_v9 = vld [vmem:[%s150_s2] ss:$0 sm:$0xff] }
   0x5   :  { %106 = vmatmul.mubr.msk.bf16.vlgmr.msra.gmra.mrb[0].mxu0 %vm31_vm2, %v22_v2 }
   0x8   :  { %v21_v3 = vld [vmem:[#allocation2] sm:$0xff] }
  0xd8   :  { %v69_v4 = vpop.f32.mrb[0].mxu0 }
  0xd9   :  { %v75_v5 = vadd.f32 %v69_v4, %v21_v3  ;;  %v107_v6 = vpop.f32.mrb[1].mxu0 }
  0xda   :  { %v72_v7 = vpop.f32.mrb[2].mxu0 }
  0xdb   :  { %77 = vst.msk [vmem:[#allocation2] sm:$0xff] %vm19_vm0, %v75_v5  ;;  %v108_v8 = vpop.f32.mrb[3].mxu0 }
  0xe2   :  { %v81_v10 = vld [vmem:[#allocation2] sm:$0xff] }
  0xe3   :  { %v89_v11 = vadd.f32 %v100_v9, %v81_v10 }
  0xe5   :  { %v90_v12 = vmax.f32 %v89_v11, 0.0 }
  0xe7   :  { %v91_v13 = vpack.c.bf16 %v90_v12, %v90_v12 }
  0xe9   :  { %93 = vst.msk [vmem:[%s151_s3] sm:$0xf] %vm92_vm3, %v91_v13 }

// kernel: _forward.15
= control target key start
LH: loop header
LB: loop body
LE: loop exit
PB: predicated region body
PF: predicated region fallthrough
CT: control target
= control target key end

     0   :  { %v624_v36 = vmov 0.0   ;;  %vm625_vm0 = vmmov 0   ;;  %vm330_vm1 = vcmask 523264   ;;  %vm19_vm2 = vcmask 261120   ;;  %s771_s1 = inlined_call_operand.vmem [shape: bf16[576,32], index: 1, kind: input, shape index: {}]   ;;  %s772_s0 = inlined_call_operand.vmem [shape: bf16[8,576], index: 0, kind: input, shape index: {}]   ;;  %s773_s2 = inlined_call_operand.vmem [shape: f32[1,32], index: 2, kind: input, shape index: {}]   ;;  %s774_s3 = inlined_call_operand.vmem [shape: bf16[8,32], index: 3, kind: output, shape index: {}]  }
   0x1   :  { %v583_v0 = vld [vmem:[%s771_s1 + $0x40] sm:$0xff]   ;;  %v587_v4 = vld [vmem:[%s771_s1 + $0x48] sm:$0xff]   ;;  %v591_v8 = vld [vmem:[%s771_s1 + $0x50] sm:$0xff]   ;;  %20 = vst.msk [vmem:[#allocation2] sm:$0xff] %vm19_vm2, %v624_v36  ;;  %vm471_vm3 = vcmask 257024  }
   0x2   :  { %v584_v1 = vld [vmem:[%s771_s1 + $0xc0] sm:$0xff]   ;;  %520 = vmatprep.subr.bf16.mxu0 %v583_v0  ;;  %v588_v5 = vld [vmem:[%s771_s1 + $0xc8] sm:$0xff]   ;;  %v592_v9 = vld [vmem:[%s771_s1 + $0xd0] sm:$0xff]  }
   0x3   :  { %v585_v2 = vld [vmem:[%s771_s1] sm:$0xff]   ;;  %542 = vmatprep.subr.bf16.mxu1 %v584_v1  ;;  %v589_v6 = vld [vmem:[%s771_s1 + $0x8] sm:$0xff]   ;;  %v593_v10 = vld [vmem:[%s771_s1 + $0x10] sm:$0xff]  }
   0x4   :  { %v586_v3 = vld [vmem:[%s771_s1 + $0x80] sm:$0xff]   ;;  %521 = vmatpush3.bf16.msra.mxu0 %v585_v2  ;;  %v590_v7 = vld [vmem:[%s771_s1 + $0x88] sm:$0xff]   ;;  %v594_v11 = vld [vmem:[%s771_s1 + $0x90] sm:$0xff]  }
   0x5   :  { %543 = vmatpush3.bf16.msra.mxu1 %v586_v3  ;;  %522 = vmatprep.subr.bf16.mxu0 %v587_v4  ;;  %v595_v12 = vld [vmem:[%s771_s1 + $0x58] sm:$0xff]   ;;  %v599_v16 = vld [vmem:[%s771_s1 + $0x60] sm:$0xff]   ;;  %v603_v20 = vld [vmem:[%s771_s1 + $0x68] sm:$0xff]  }
   0x6   :  { %544 = vmatprep.subr.bf16.mxu1 %v588_v5  ;;  %v596_v13 = vld [vmem:[%s771_s1 + $0xd8] sm:$0xff]   ;;  %v600_v17 = vld [vmem:[%s771_s1 + $0xe0] sm:$0xff]   ;;  %v604_v21 = vld [vmem:[%s771_s1 + $0xe8] sm:$0xff]  }
   0x7   :  { %v597_v14 = vld [vmem:[%s771_s1 + $0x18] sm:$0xff]   ;;  %v601_v18 = vld [vmem:[%s771_s1 + $0x20] sm:$0xff]   ;;  %v605_v22 = vld [vmem:[%s771_s1 + $0x28] sm:$0xff]  }
   0x8   :  { %523 = vmatpush3.bf16.msra.mxu0 %v589_v6  ;;  %v598_v15 = vld [vmem:[%s771_s1 + $0x98] sm:$0xff]   ;;  %v602_v19 = vld [vmem:[%s771_s1 + $0xa0] sm:$0xff]   ;;  %v606_v23 = vld [vmem:[%s771_s1 + $0xa8] sm:$0xff]  }
   0x9   :  { %545 = vmatpush3.bf16.msra.mxu1 %v590_v7  ;;  %524 = vmatprep.subr.bf16.mxu0 %v591_v8  ;;  %v607_v24 = vld [vmem:[%s771_s1 + $0x70] sm:$0xff]   ;;  %v611_v28 = vld [vmem:[%s771_s1 + $0x78] sm:$0xff]   ;;  %v22_v32 = vld [vmem:[%s772_s0] sm:$0xff] }
   0xa   :  { %546 = vmatprep.subr.bf16.mxu1 %v592_v9  ;;  %v608_v25 = vld [vmem:[%s771_s1 + $0xf0] sm:$0xff]   ;;  %v612_v29 = vld [vmem:[%s771_s1 + $0xf8] sm:$0xff]   ;;  %v477_v33 = vcombine.low %v22_v32, %v22_v32  ;;  %v478_v34 = vcombine.high %v22_v32, %v22_v32  ;;  %v23_v35 = vld [vmem:[%s772_s0 + $0x8] sm:$0xff] }
   0xb   :  { %v609_v26 = vld [vmem:[%s771_s1 + $0x30] sm:$0xff]   ;;  %v613_v30 = vld [vmem:[%s771_s1 + $0x38] sm:$0xff]   ;;  %v479_v37 = vcombine.low %v23_v35, %v23_v35  ;;  %v480_v38 = vcombine.high %v23_v35, %v23_v35  ;;  %v620_v39 = vld [vmem:[%s771_s1 + $0x100] sm:$0xff]  }
   0xc   :  { %525 = vmatpush3.bf16.msra.mxu0 %v593_v10  ;;  %v610_v27 = vld [vmem:[%s771_s1 + $0xb0] sm:$0xff]   ;;  %v614_v31 = vld [vmem:[%s771_s1 + $0xb8] sm:$0xff]   ;;  %366 = vmatprep.mubr.bf16.mxu0 %v478_v34  ;;  %v621_v40 = vld [vmem:[%s771_s1 + $0x108] sm:$0xff]  }
   0xd   :  { %547 = vmatpush3.bf16.msra.mxu1 %v594_v11  ;;  %526 = vmatprep.subr.bf16.mxu0 %v595_v12  ;;  %v622_v41 = vld [vmem:[%s771_s1 + $0x110] sm:$0xff]   ;;  %v623_v42 = vld [vmem:[%s771_s1 + $0x118] sm:$0xff]   ;;  %v21_v55 = vld [vmem:[#allocation2] sm:$0xff] }
   0xe   :  { %548 = vmatprep.subr.bf16.mxu1 %v596_v13  ;;  %406 = vmatprep.mubr.bf16.mxu1 %v480_v38  ;;  %v617_v43 = vld [vmem:[%s772_s0 + $0x10] ss:$0 sps:$4 sm:$0xff]   ;;  %v519_v62 = vld [vmem:[%s773_s2] ss:$0 sm:$0xff] }
  0x10   :  { %527 = vmatpush3.bf16.msra.mxu0 %v597_v14 }
  0x11   :  { %549 = vmatpush3.bf16.msra.mxu1 %v598_v15  ;;  %528 = vmatprep.subr.bf16.mxu0 %v599_v16 }
  0x12   :  { %550 = vmatprep.subr.bf16.mxu1 %v600_v17 }
  0x14   :  { %529 = vmatpush3.bf16.msra.mxu0 %v601_v18 }
  0x15   :  { %551 = vmatpush3.bf16.msra.mxu1 %v602_v19  ;;  %530 = vmatprep.subr.bf16.mxu0 %v603_v20 }
  0x16   :  { %552 = vmatprep.subr.bf16.mxu1 %v604_v21 }
  0x18   :  { %531 = vmatpush3.bf16.msra.mxu0 %v605_v22 }
  0x19   :  { %553 = vmatpush3.bf16.msra.mxu1 %v606_v23  ;;  %532 = vmatprep.subr.bf16.mxu0 %v607_v24 }
  0x1a   :  { %554 = vmatprep.subr.bf16.mxu1 %v608_v25 }
  0x1c   :  { %533 = vmatpush3.bf16.msra.mxu0 %v609_v26 }
  0x1d   :  { %555 = vmatpush3.bf16.msra.mxu1 %v610_v27  ;;  %534 = vmatprep.subr.bf16.mxu0 %v611_v28 }
  0x1e   :  { %556 = vmatprep.subr.bf16.mxu1 %v612_v29 }
  0x20   :  { %535 = vmatpush3.bf16.msra.mxu0 %v613_v30 }
  0x21   :  { %557 = vmatpush3.bf16.msra.mxu1 %v614_v31  ;;  %569 = vmatprep.subr.bf16.mxu0 %v624_v36 }
  0x23   :  { %367 = vmatmul.mubr.bf16.vlgmr.msra.gmra.mrb[0].mxu0 %v477_v33 }
  0x24   :  { %407 = vmatmul.mubr.bf16.vlgmr.msra.gmra.mrb[0].mxu1 %v479_v37  ;;  %570 = vmatpush3.bf16.msra.mxu0 %v620_v39 }
  0x25   :  { %571 = vmatprep.subr.bf16.mxu0 %v624_v36  ;;  %577 = vmatprep.mubr.msk.bf16.mxu0 %vm625_vm0, %v624_v36 }
  0x28   :  { %572 = vmatpush3.bf16.msra.mxu0 %v621_v40 }
  0x29   :  { %573 = vmatprep.subr.bf16.mxu0 %v624_v36 }
  0x2c   :  { %574 = vmatpush3.bf16.msra.mxu0 %v622_v41 }
  0x2d   :  { %575 = vmatprep.subr.bf16.mxu0 %v624_v36 }
  0x30   :  { %576 = vmatpush3.bf16.msra.mxu0 %v623_v42 }
  0x33   :  { %578 = vmatmul.mubr.msk.bf16.vlgmr.msra.gmra.mrb[4].mxu0 %vm330_vm1, %v617_v43 }
  0xf6   :  { %v536_v44 = vpop.f32.mrb[0].mxu0 }
  0xf7   :  { %v558_v45 = vpop.f32.mrb[0].mxu1  ;;  %v537_v46 = vpop.f32.mrb[1].mxu0 }
  0xf8   :  { %v538_v47 = vadd.f32 %v537_v46, %v536_v44  ;;  %v559_v48 = vpop.f32.mrb[1].mxu1  ;;  %v539_v49 = vpop.f32.mrb[2].mxu0 }
  0xf9   :  { %v560_v50 = vadd.f32 %v559_v48, %v558_v45  ;;  %v540_v51 = vpop.f32.mrb[3].mxu0  ;;  %v561_v52 = vpop.f32.mrb[2].mxu1 }
  0xfa   :  { %v562_v53 = vpop.f32.mrb[3].mxu1 }
  0xfb   :  { %v409_v54 = vadd.f32 %v560_v50, %v538_v47 }
 0x106   :  { %v448_v56 = vpop.f32.mrb[4].mxu0 }
 0x107   :  { %v449_v57 = vadd.f32 %v448_v56, %v409_v54  ;;  %v579_v58 = vpop.f32.mrb[5].mxu0 }
 0x108   :  { %v451_v59 = vpop.f32.mrb[6].mxu0 }
 0x109   :  { %v454_v60 = vadd.f32 %v449_v57, %v21_v55  ;;  %v580_v61 = vpop.f32.mrb[7].mxu0 }
 0x10b   :  { %456 = vst.msk [vmem:[#allocation2] sm:$0xff] %vm19_vm2, %v454_v60 }
 0x112   :  { %v460_v63 = vld [vmem:[#allocation2] sm:$0xff] }
 0x113   :  { %v468_v0 = vadd.f32 %v519_v62, %v460_v63 }
 0x115   :  { %v469_v1 = vmax.f32 %v468_v0, 0.0 }
 0x117   :  { %v470_v2 = vpack.c.bf16 %v469_v1, %v469_v1 }
 0x119   :  { %472 = vst.msk [vmem:[%s774_s3] sm:$0xf] %vm471_vm3, %v470_v2 }

// kernel: _forward.18
= control target key start
LH: loop header
LB: loop body
LE: loop exit
PB: predicated region body
PF: predicated region fallthrough
CT: control target
= control target key end

     0   :  { %vm50_vm0 = vcmask 1043456   ;;  %vm43_vm1 = vcmask 64512   ;;  %vm19_vm2 = vcmask 130048   ;;  %v185_v1 = vmov 0.0   ;;  %s238_s1 = inlined_call_operand.vmem [shape: bf16[8,16], index: 1, kind: input, shape index: {}]   ;;  %s239_s0 = inlined_call_operand.vmem [shape: bf16[32,8], index: 0, kind: input, shape index: {}]   ;;  %s240_s2 = inlined_call_operand.vmem [shape: f32[1,16], index: 2, kind: input, shape index: {}]   ;;  %s241_s3 = inlined_call_operand.vmem [shape: bf16[32,16], index: 3, kind: output, shape index: {}]  }
   0x1   :  { %v32_v0 = vld [vmem:[%s238_s1] sm:$0xf]  ;;  %22 = vst.msk [vmem:[#allocation2 + $0x10] sm:$0xff] %vm19_vm2, %v185_v1  ;;  %20 = vst.msk [vmem:[#allocation2] sm:$0xff] %vm19_vm2, %v185_v1  ;;  %v184_v4 = vld [vmem:[%s239_s0 + $0x8] sm:$0xff]   ;;  %vm150_vm3 = vcmask 125952  }
   0x2   :  { %21 = vst.msk [vmem:[#allocation2 + $0x8] sm:$0xff] %vm19_vm2, %v185_v1  ;;  %23 = vst.msk [vmem:[#allocation2 + $0x18] sm:$0xff] %vm19_vm2, %v185_v1  ;;  %181 = vmatprep.subr.msk.bf16.mxu0 %vm50_vm0, %v32_v0  ;;  %v52_v2 = vsel %vm50_vm0, %v32_v0, 0  ;;  %v183_v3 = vld [vmem:[%s239_s0] sm:$0xff]  }
   0x3   :  { %176 = vmatpush3.bf16.msra.mxu0 %v52_v2  ;;  %177 = vmatprep.mubr.msk.bf16.mxu0 %vm43_vm1, %v183_v3  ;;  %v163_v17 = vld [vmem:[%s240_s2] ss:$0 sm:$0xff] }
   0x6   :  { %178 = vmatmul.mubr.msk.bf16.vlgmr.msra.gmra.mrb[0].mxu0 %vm43_vm1, %v184_v4 }
   0x8   :  { %v26_v5 = vld [vmem:[#allocation2 + $0x10] sm:$0xff]  ;;  %v24_v6 = vld [vmem:[#allocation2] sm:$0xff] }
   0x9   :  { %v27_v8 = vld [vmem:[#allocation2 + $0x18] sm:$0xff]  ;;  %v25_v11 = vld [vmem:[#allocation2 + $0x8] sm:$0xff] }
  0xd9   :  { %v179_v7 = vpop.f32.mrb[0].mxu0 }
  0xda   :  { %v105_v9 = vadd.f32 %v179_v7, %v26_v5  ;;  %v88_v10 = vpop.f32.mrb[1].mxu0 }
  0xdb   :  { %v103_v12 = vadd.f32 %v88_v10, %v24_v6  ;;  %v180_v13 = vpop.f32.mrb[2].mxu0 }
  0xdc   :  { %110 = vst.msk [vmem:[#allocation2 + $0x10] sm:$0xff] %vm19_vm2, %v105_v9  ;;  %v106_v14 = vadd.f32 %v180_v13, %v27_v8  ;;  %v91_v15 = vpop.f32.mrb[3].mxu0 }
  0xdd   :  { %108 = vst.msk [vmem:[#allocation2] sm:$0xff] %vm19_vm2, %v103_v12  ;;  %v104_v16 = vadd.f32 %v91_v15, %v25_v11 }
  0xde   :  { %111 = vst.msk [vmem:[#allocation2 + $0x18] sm:$0xff] %vm19_vm2, %v106_v14 }
  0xdf   :  { %109 = vst.msk [vmem:[#allocation2 + $0x8] sm:$0xff] %vm19_vm2, %v104_v16 }
  0xe3   :  { %v117_v18 = vld [vmem:[#allocation2 + $0x10] sm:$0xff] }
  0xe4   :  { %v128_v19 = vadd.f32 %v163_v17, %v117_v18  ;;  %v115_v20 = vld [vmem:[#allocation2] sm:$0xff] }
  0xe5   :  { %v126_v21 = vadd.f32 %v163_v17, %v115_v20  ;;  %v118_v22 = vld [vmem:[#allocation2 + $0x18] sm:$0xff] }
  0xe6   :  { %v132_v23 = vmax.f32 %v128_v19, 0.0  ;;  %v129_v24 = vadd.f32 %v163_v17, %v118_v22  ;;  %v116_v25 = vld [vmem:[#allocation2 + $0x8] sm:$0xff] }
  0xe7   :  { %v130_v26 = vmax.f32 %v126_v21, 0.0  ;;  %v127_v27 = vadd.f32 %v163_v17, %v116_v25 }
  0xe8   :  { %v170_v28 = vpack.c.bf16 %v132_v23, %v132_v23  ;;  %v133_v29 = vmax.f32 %v129_v24, 0.0 }
  0xe9   :  { %v168_v30 = vpack.c.bf16 %v130_v26, %v130_v26  ;;  %v131_v31 = vmax.f32 %v127_v27, 0.0 }
  0xea   :  { %153 = vst.msk [vmem:[%s241_s3 + $0x8] sm:$0xf] %vm150_vm3, %v170_v28  ;;  %v171_v32 = vpack.c.bf16 %v133_v29, %v133_v29 }
  0xeb   :  { %151 = vst.msk [vmem:[%s241_s3] sm:$0xf] %vm150_vm3, %v168_v30  ;;  %v169_v33 = vpack.c.bf16 %v131_v31, %v131_v31 }
  0xec   :  { %154 = vst.msk [vmem:[%s241_s3 + $0xc] sm:$0xf] %vm150_vm3, %v171_v32 }
  0xed   :  { %152 = vst.msk [vmem:[%s241_s3 + $0x4] sm:$0xf] %vm150_vm3, %v169_v33 }

// kernel: _forward.19
= control target key start
LH: loop header
LB: loop body
LE: loop exit
PB: predicated region body
PF: predicated region fallthrough
CT: control target
= control target key end

     0   :  { %vm134_vm0 = vcmask 1041408   ;;  %vm19_vm1 = vcmask 31744   ;;  %v434_v1 = vmov 0.0   ;;  %s610_s1 = inlined_call_operand.vmem [shape: bf16[4,4], index: 1, kind: input, shape index: {}]   ;;  %s611_s0 = inlined_call_operand.vmem [shape: bf16[128,4], index: 0, kind: input, shape index: {}]   ;;  %s612_s2 = inlined_call_operand.vmem [shape: f32[1,4], index: 2, kind: input, shape index: {}]   ;;  %s613_s3 = inlined_call_operand.vmem [shape: f32[128,4], index: 3, kind: output, shape index: {}]  }
   0x1   :  { %v68_v0 = vld [vmem:[%s610_s1] sm:$0x3]  ;;  %22 = vst.msk [vmem:[#allocation2 + $0x10] sm:$0xff] %vm19_vm1, %v434_v1  ;;  %20 = vst.msk [vmem:[#allocation2] sm:$0xff] %vm19_vm1, %v434_v1  ;;  %v396_v5 = vld [vmem:[%s611_s0 + $0x8] sm:$0xff]  }
   0x2   :  { %21 = vst.msk [vmem:[#allocation2 + $0x8] sm:$0xff] %vm19_vm1, %v434_v1  ;;  %23 = vst.msk [vmem:[#allocation2 + $0x18] sm:$0xff] %vm19_vm1, %v434_v1  ;;  %391 = vmatprep.subr.msk.bf16.mxu0 %vm134_vm0, %v68_v0  ;;  %392 = vmatprep.subr.msk.bf16.mxu1 %vm134_vm0, %v68_v0  ;;  %v136_v2 = vsel %vm134_vm0, %v68_v0, 0  ;;  %v394_v3 = vld [vmem:[%s611_s0] sm:$0xff]   ;;  %v397_v6 = vld [vmem:[%s611_s0 + $0x28] sm:$0xff]  }
   0x3   :  { %24 = vst.msk [vmem:[#allocation2 + $0x20] sm:$0xff] %vm19_vm1, %v434_v1  ;;  %25 = vst.msk [vmem:[#allocation2 + $0x28] sm:$0xff] %vm19_vm1, %v434_v1  ;;  %372 = vmatpush3.bf16.msra.mxu0 %v136_v2  ;;  %390 = vmatpush3.bf16.msra.mxu1 %v136_v2  ;;  %v395_v4 = vld [vmem:[%s611_s0 + $0x20] sm:$0xff]   ;;  %v398_v7 = vld [vmem:[%s611_s0 + $0x10] sm:$0xff]  }
   0x4   :  { %26 = vst.msk [vmem:[#allocation2 + $0x30] sm:$0xff] %vm19_vm1, %v434_v1  ;;  %27 = vst.msk [vmem:[#allocation2 + $0x38] sm:$0xff] %vm19_vm1, %v434_v1  ;;  %373 = vmatprep.mubr.msk.bf16.mxu0 %vm19_vm1, %v394_v3  ;;  %381 = vmatprep.mubr.msk.bf16.mxu1 %vm19_vm1, %v395_v4  ;;  %v399_v8 = vld [vmem:[%s611_s0 + $0x30] sm:$0xff]   ;;  %v400_v9 = vld [vmem:[%s611_s0 + $0x18] sm:$0xff]  }
   0x5   :  { %28 = vst.msk [vmem:[#allocation2 + $0x40] sm:$0xff] %vm19_vm1, %v434_v1  ;;  %29 = vst.msk [vmem:[#allocation2 + $0x48] sm:$0xff] %vm19_vm1, %v434_v1  ;;  %v401_v10 = vld [vmem:[%s611_s0 + $0x38] sm:$0xff]   ;;  %v520_v38 = vld [vmem:[%s612_s2] ss:$0 sm:$0xff] }
   0x6   :  { %30 = vst.msk [vmem:[#allocation2 + $0x50] sm:$0xff] %vm19_vm1, %v434_v1  ;;  %31 = vst.msk [vmem:[#allocation2 + $0x58] sm:$0xff] %vm19_vm1, %v434_v1  ;;  %374 = vmatmul.mubr.msk.bf16.vlgmr.msra.gmra.mrb[0].mxu0 %vm19_vm1, %v396_v5  ;;  %382 = vmatmul.mubr.msk.bf16.vlgmr.msra.gmra.mrb[0].mxu1 %vm19_vm1, %v397_v6 }
   0x7   :  { %32 = vst.msk [vmem:[#allocation2 + $0x60] sm:$0xff] %vm19_vm1, %v434_v1  ;;  %33 = vst.msk [vmem:[#allocation2 + $0x68] sm:$0xff] %vm19_vm1, %v434_v1  ;;  %377 = vmatprep.mubr.msk.bf16.mxu0 %vm19_vm1, %v398_v7  ;;  %385 = vmatprep.mubr.msk.bf16.mxu1 %vm19_vm1, %v399_v8 }
   0x8   :  { %34 = vst.msk [vmem:[#allocation2 + $0x70] sm:$0xff] %vm19_vm1, %v434_v1  ;;  %35 = vst.msk [vmem:[#allocation2 + $0x78] sm:$0xff] %vm19_vm1, %v434_v1  ;;  %v38_v11 = vld [vmem:[#allocation2 + $0x10] sm:$0xff]  ;;  %v36_v13 = vld [vmem:[#allocation2] sm:$0xff] }
   0x9   :  { %v39_v16 = vld [vmem:[#allocation2 + $0x18] sm:$0xff]  ;;  %v37_v21 = vld [vmem:[#allocation2 + $0x8] sm:$0xff] }
   0xa   :  { %v40_v37 = vld [vmem:[#allocation2 + $0x20] sm:$0xff]  ;;  %v41_v46 = vld [vmem:[#allocation2 + $0x28] sm:$0xff] }
   0xb   :  { %v42_v35 = vld [vmem:[#allocation2 + $0x30] sm:$0xff]  ;;  %v43_v41 = vld [vmem:[#allocation2 + $0x38] sm:$0xff] }
   0xc   :  { %v44_v15 = vld [vmem:[#allocation2 + $0x40] sm:$0xff]  ;;  %v45_v26 = vld [vmem:[#allocation2 + $0x48] sm:$0xff] }
   0xd   :  { %v46_v12 = vld [vmem:[#allocation2 + $0x50] sm:$0xff]  ;;  %v47_v20 = vld [vmem:[#allocation2 + $0x58] sm:$0xff] }
   0xe   :  { %378 = vmatmul.mubr.msk.bf16.gmra.mrb[4].mxu0 %vm19_vm1, %v400_v9  ;;  %386 = vmatmul.mubr.msk.bf16.gmra.mrb[4].mxu1 %vm19_vm1, %v401_v10  ;;  %v48_v40 = vld [vmem:[#allocation2 + $0x60] sm:$0xff]  ;;  %v49_v52 = vld [vmem:[#allocation2 + $0x68] sm:$0xff] }
   0xf   :  { %v50_v36 = vld [vmem:[#allocation2 + $0x70] sm:$0xff]  ;;  %v51_v45 = vld [vmem:[#allocation2 + $0x78] sm:$0xff] }
  0xd9   :  { %v375_v14 = vpop.f32.mrb[0].mxu0  ;;  %v383_v18 = vpop.f32.mrb[0].mxu1 }
  0xda   :  { %v237_v17 = vadd.f32 %v375_v14, %v38_v11  ;;  %v172_v19 = vpop.f32.mrb[1].mxu0  ;;  %v245_v22 = vadd.f32 %v383_v18, %v46_v12  ;;  %v204_v24 = vpop.f32.mrb[1].mxu1 }
  0xdb   :  { %v235_v23 = vadd.f32 %v172_v19, %v36_v13  ;;  %v376_v25 = vpop.f32.mrb[2].mxu0  ;;  %v243_v27 = vadd.f32 %v204_v24, %v44_v15  ;;  %v384_v29 = vpop.f32.mrb[2].mxu1 }
  0xdc   :  { %253 = vst.msk [vmem:[#allocation2 + $0x10] sm:$0xff] %vm19_vm1, %v237_v17  ;;  %v238_v28 = vadd.f32 %v376_v25, %v39_v16  ;;  %v175_v30 = vpop.f32.mrb[3].mxu0  ;;  %261 = vst.msk [vmem:[#allocation2 + $0x50] sm:$0xff] %vm19_vm1, %v245_v22  ;;  %v246_v31 = vadd.f32 %v384_v29, %v47_v20  ;;  %v207_v33 = vpop.f32.mrb[3].mxu1 }
  0xdd   :  { %251 = vst.msk [vmem:[#allocation2] sm:$0xff] %vm19_vm1, %v235_v23  ;;  %v236_v32 = vadd.f32 %v175_v30, %v37_v21  ;;  %259 = vst.msk [vmem:[#allocation2 + $0x40] sm:$0xff] %vm19_vm1, %v243_v27  ;;  %v244_v34 = vadd.f32 %v207_v33, %v45_v26 }
  0xde   :  { %254 = vst.msk [vmem:[#allocation2 + $0x18] sm:$0xff] %vm19_vm1, %v238_v28  ;;  %262 = vst.msk [vmem:[#allocation2 + $0x58] sm:$0xff] %vm19_vm1, %v246_v31 }
  0xdf   :  { %252 = vst.msk [vmem:[#allocation2 + $0x8] sm:$0xff] %vm19_vm1, %v236_v32  ;;  %260 = vst.msk [vmem:[#allocation2 + $0x48] sm:$0xff] %vm19_vm1, %v244_v34 }
  0xe1   :  { %v379_v39 = vpop.f32.mrb[4].mxu0  ;;  %v387_v43 = vpop.f32.mrb[4].mxu1 }
  0xe2   :  { %v241_v42 = vadd.f32 %v379_v39, %v42_v35  ;;  %v188_v44 = vpop.f32.mrb[5].mxu0  ;;  %v249_v48 = vadd.f32 %v387_v43, %v50_v36  ;;  %v220_v50 = vpop.f32.mrb[5].mxu1 }
  0xe3   :  { %v272_v47 = vld [vmem:[#allocation2 + $0x10] sm:$0xff]  ;;  %v239_v49 = vadd.f32 %v188_v44, %v40_v37  ;;  %v380_v51 = vpop.f32.mrb[6].mxu0  ;;  %v247_v56 = vadd.f32 %v220_v50, %v48_v40  ;;  %v388_v58 = vpop.f32.mrb[6].mxu1 }
  0xe4   :  { %v295_v53 = vadd.f32 %v520_v38, %v272_v47  ;;  %v280_v54 = vld [vmem:[#allocation2 + $0x50] sm:$0xff]  ;;  %v270_v55 = vld [vmem:[#allocation2] sm:$0xff]  ;;  %257 = vst.msk [vmem:[#allocation2 + $0x30] sm:$0xff] %vm19_vm1, %v241_v42  ;;  %v242_v57 = vadd.f32 %v380_v51, %v43_v41  ;;  %v191_v59 = vpop.f32.mrb[7].mxu0  ;;  %265 = vst.msk [vmem:[#allocation2 + $0x70] sm:$0xff] %vm19_vm1, %v249_v48  ;;  %v250_v0 = vadd.f32 %v388_v58, %v51_v45  ;;  %v223_v2 = vpop.f32.mrb[7].mxu1 }
  0xe5   :  { %v303_v60 = vadd.f32 %v520_v38, %v280_v54  ;;  %v293_v61 = vadd.f32 %v520_v38, %v270_v55  ;;  %v278_v62 = vld [vmem:[#allocation2 + $0x40] sm:$0xff]  ;;  %v273_v63 = vld [vmem:[#allocation2 + $0x18] sm:$0xff]  ;;  %255 = vst.msk [vmem:[#allocation2 + $0x20] sm:$0xff] %vm19_vm1, %v239_v49  ;;  %v240_v1 = vadd.f32 %v191_v59, %v41_v46  ;;  %263 = vst.msk [vmem:[#allocation2 + $0x60] sm:$0xff] %vm19_vm1, %v247_v56 }
  0xe6   :  { %402 = vtanh.f32 %v295_v53  ;;  %v301_v3 = vadd.f32 %v520_v38, %v278_v62  ;;  %v296_v4 = vadd.f32 %v520_v38, %v273_v63  ;;  %v281_v5 = vld [vmem:[#allocation2 + $0x58] sm:$0xff]  ;;  %v271_v6 = vld [vmem:[#allocation2 + $0x8] sm:$0xff]  ;;  %258 = vst.msk [vmem:[#allocation2 + $0x38] sm:$0xff] %vm19_vm1, %v242_v57  ;;  %v248_v7 = vadd.f32 %v223_v2, %v49_v52  ;;  %266 = vst.msk [vmem:[#allocation2 + $0x78] sm:$0xff] %vm19_vm1, %v250_v0 }
  0xe7   :  { %404 = vtanh.f32 %v303_v60  ;;  %v304_v8 = vadd.f32 %v520_v38, %v281_v5  ;;  %v279_v9 = vld [vmem:[#allocation2 + $0x48] sm:$0xff]  ;;  %256 = vst.msk [vmem:[#allocation2 + $0x28] sm:$0xff] %vm19_vm1, %v240_v1  ;;  %v294_v10 = vadd.f32 %v520_v38, %v271_v6 }
  0xe8   :  { %406 = vtanh.f32 %v293_v61  ;;  %264 = vst.msk [vmem:[#allocation2 + $0x68] sm:$0xff] %vm19_vm1, %v248_v7  ;;  %v302_v11 = vadd.f32 %v520_v38, %v279_v9 }
  0xe9   :  { %408 = vtanh.f32 %v301_v3 }
  0xea   :  { %410 = vtanh.f32 %v296_v4 }
  0xeb   :  { %412 = vtanh.f32 %v304_v8  ;;  %v276_v12 = vld [vmem:[#allocation2 + $0x30] sm:$0xff] }
  0xec   :  { %414 = vtanh.f32 %v294_v10  ;;  %v299_v13 = vadd.f32 %v520_v38, %v276_v12  ;;  %v284_v14 = vld [vmem:[#allocation2 + $0x70] sm:$0xff]  ;;  %v274_v15 = vld [vmem:[#allocation2 + $0x20] sm:$0xff] }
  0xed   :  { %416 = vtanh.f32 %v302_v11  ;;  %v307_v16 = vadd.f32 %v520_v38, %v284_v14  ;;  %v297_v17 = vadd.f32 %v520_v38, %v274_v15  ;;  %v282_v18 = vld [vmem:[#allocation2 + $0x60] sm:$0xff]  ;;  %v277_v19 = vld [vmem:[#allocation2 + $0x38] sm:$0xff] }
  0xee   :  { %418 = vtanh.f32 %v299_v13  ;;  %v305_v20 = vadd.f32 %v520_v38, %v282_v18  ;;  %v300_v21 = vadd.f32 %v520_v38, %v277_v19  ;;  %v285_v22 = vld [vmem:[#allocation2 + $0x78] sm:$0xff]  ;;  %v275_v23 = vld [vmem:[#allocation2 + $0x28] sm:$0xff] }
  0xef   :  { %420 = vtanh.f32 %v307_v16  ;;  %v308_v24 = vadd.f32 %v520_v38, %v285_v22  ;;  %v283_v25 = vld [vmem:[#allocation2 + $0x68] sm:$0xff]  ;;  %v298_v27 = vadd.f32 %v520_v38, %v275_v23 }
  0xf0   :  { %v403_v26 = vpop.eup %402  ;;  %422 = vtanh.f32 %v297_v17  ;;  %v306_v29 = vadd.f32 %v520_v38, %v283_v25 }
  0xf1   :  { %v405_v28 = vpop.eup %404  ;;  %327 = vst.msk [vmem:[%s613_s3 + $0x10] sm:$0xff] %vm19_vm1, %v403_v26  ;;  %424 = vtanh.f32 %v305_v20 }
  0xf2   :  { %v407_v30 = vpop.eup %406  ;;  %335 = vst.msk [vmem:[%s613_s3 + $0x50] sm:$0xff] %vm19_vm1, %v405_v28  ;;  %426 = vtanh.f32 %v300_v21 }
  0xf3   :  { %v409_v31 = vpop.eup %408  ;;  %325 = vst.msk [vmem:[%s613_s3] sm:$0xff] %vm19_vm1, %v407_v30  ;;  %428 = vtanh.f32 %v308_v24 }
  0xf4   :  { %v411_v32 = vpop.eup %410  ;;  %333 = vst.msk [vmem:[%s613_s3 + $0x40] sm:$0xff] %vm19_vm1, %v409_v31  ;;  %430 = vtanh.f32 %v298_v27 }
  0xf5   :  { %v413_v33 = vpop.eup %412  ;;  %328 = vst.msk [vmem:[%s613_s3 + $0x18] sm:$0xff] %vm19_vm1, %v411_v32  ;;  %432 = vtanh.f32 %v306_v29 }
  0xf6   :  { %v415_v34 = vpop.eup %414  ;;  %336 = vst.msk [vmem:[%s613_s3 + $0x58] sm:$0xff] %vm19_vm1, %v413_v33 }
  0xf7   :  { %v417_v35 = vpop.eup %416  ;;  %326 = vst.msk [vmem:[%s613_s3 + $0x8] sm:$0xff] %vm19_vm1, %v415_v34 }
  0xf8   :  { %v419_v36 = vpop.eup %418  ;;  %334 = vst.msk [vmem:[%s613_s3 + $0x48] sm:$0xff] %vm19_vm1, %v417_v35 }
  0xf9   :  { %v421_v37 = vpop.eup %420  ;;  %331 = vst.msk [vmem:[%s613_s3 + $0x30] sm:$0xff] %vm19_vm1, %v419_v36 }
  0xfa   :  { %v423_v38 = vpop.eup %422  ;;  %339 = vst.msk [vmem:[%s613_s3 + $0x70] sm:$0xff] %vm19_vm1, %v421_v37 }
  0xfb   :  { %v425_v39 = vpop.eup %424  ;;  %329 = vst.msk [vmem:[%s613_s3 + $0x20] sm:$0xff] %vm19_vm1, %v423_v38 }
  0xfc   :  { %v427_v40 = vpop.eup %426  ;;  %337 = vst.msk [vmem:[%s613_s3 + $0x60] sm:$0xff] %vm19_vm1, %v425_v39 }
  0xfd   :  { %v429_v41 = vpop.eup %428  ;;  %332 = vst.msk [vmem:[%s613_s3 + $0x38] sm:$0xff] %vm19_vm1, %v427_v40 }
  0xfe   :  { %v431_v42 = vpop.eup %430  ;;  %340 = vst.msk [vmem:[%s613_s3 + $0x78] sm:$0xff] %vm19_vm1, %v429_v41 }
  0xff   :  { %v433_v43 = vpop.eup %432  ;;  %330 = vst.msk [vmem:[%s613_s3 + $0x28] sm:$0xff] %vm19_vm1, %v431_v42 }
 0x100   :  { %338 = vst.msk [vmem:[%s613_s3 + $0x68] sm:$0xff] %vm19_vm1, %v433_v43 }

</bundles_post_ra>
